<compile_context>
chip_gen: v5e
topology: v5e:2x2
jax: 0.10.0
libtpu: 0.0.40
codegen_flags: <defaults>
</compile_context>

<pallas_src>
import jax
import jax.numpy as jnp
from jax.experimental import pallas as pl
from jax.experimental.pallas import tpu as pltpu


# ----------------------------- hyperparameters ------------------------------
OUTPUT_DIM = 16      # Hyperparameter.OUTPUT_DIM
EMBEDDING_DIM = 32   # Hyperparameter.EMBEDDING_DIM
HIDDEN_DIM = 32      # Hyperparameter.HIDDEN_DIM
NUM_LAYERS = 2       # Hyperparameter.NUM_LAYERS


# --------------------------------- kernel -----------------------------------
def decoder_kernel(x_ref, h0_ref, c0_ref,
                   we_ref, be_ref,
                   wih0_ref, whh0_ref, wfu_ref, b_ref,
                   wo_ref, bo_ref,
                   pred_ref, h_out_ref, c_out_ref):
    """Single-invocation kernel (no grid): everything lives in VMEM.

    x_ref    : (T*B, OUTPUT_DIM)   time-major, flattened by wrapper
    h0_ref   : (L, B, H)           c0_ref : (L, B, H)
    we_ref   : (OUTPUT_DIM, E)     be_ref : (1, E)
    wih0_ref : (E, 4H)             layer-0 input->gates weight
    whh0_ref : (H, 4H)             layer-0 recurrent weight
    wfu_ref  : (max(L-1,1), E+H, 4H)  fused [wih[l]; whh[l]] for layers >= 1
    b_ref    : (L, 1, 4H)          fused bias (b_ih + b_hh) per layer
    wo_ref   : (H, OUTPUT_DIM)     bo_ref : (1, OUTPUT_DIM)
    pred_ref : (T*B, OUTPUT_DIM)   h_out_ref/c_out_ref : (L, B, H)
    """
    TB = x_ref.shape[0]
    L, B, H = h0_ref.shape
    T = TB // B

    # ---- embedding: Linear + ReLU for ALL timesteps (hoisted; bias folded).
    # Dropout(0.5) is identity in eval mode.
    # TODO(synk): training-mode dropout (embedding + inter-layer LSTM) not implemented.
    emb = jnp.maximum(
        jnp.dot(x_ref[...], we_ref[...], preferred_element_type=jnp.float32)
        + be_ref[...],
        0.0)                                                     # (T*B, E)

    # ---- layer-0 input->gates for ALL timesteps, hoisted (bias folded).
    gates_in0 = (jnp.dot(emb, wih0_ref[...],
                         preferred_element_type=jnp.float32)
                 + b_ref[0])                                     # (T*B, 4H)

    # ---- hoist every per-step ref load / broadcast out of the unrolled loop.
    whh0 = whh0_ref[...]                                         # (H, 4H)
    wfu = [wfu_ref[l - 1] for l in range(1, L)]                  # (E+H, 4H) each
    b_up = [jnp.broadcast_to(b_ref[l], (B, 4 * H)) for l in range(1, L)]

    # Recurrent state and per-layer output sequences carried in vregs.
    h_st = [h0_ref[l].astype(jnp.float32) for l in range(L)]     # (B, H)
    c_st = [c0_ref[l].astype(jnp.float32) for l in range(L)]     # (B, H)
    out_seq = [[None] * T for _ in range(L)]

    def lstm_cell(gates, c_prev):
        # Whole-vreg activations: one sigmoid + one tanh over the full (B,4H)
        # gates block; slices come off the EUP dependency chain.
        sig = jax.nn.sigmoid(gates)
        tah = jnp.tanh(gates)
        i_g = sig[:, 0 * H:1 * H]          # PyTorch gate order: i, f, g, o
        f_g = sig[:, 1 * H:2 * H]
        g_g = tah[:, 2 * H:3 * H]
        o_g = sig[:, 3 * H:4 * H]
        c_new = f_g * c_prev + i_g * g_g
        h_new = o_g * jnp.tanh(c_new)
        return h_new, c_new

    # ---- wavefront recurrence: at step s, layer l handles t = s - l.
    # The L cell updates inside one wavefront step are data-independent,
    # so serial depth is T + L - 1 instead of T * L.
    for s in range(T + L - 1):
        for l in range(L):
            t = s - l
            if t < 0 or t >= T:
                continue
            if l == 0:
                gates = gates_in0[t * B:(t + 1) * B, :] + jnp.dot(
                    h_st[0], whh0, preferred_element_type=jnp.float32)
            else:
                inp = jnp.concatenate([out_seq[l - 1][t], h_st[l]], axis=1)
                gates = jnp.dot(inp, wfu[l - 1],
                                preferred_element_type=jnp.float32) + b_up[l - 1]
            h_new, c_new = lstm_cell(gates, c_st[l])
            h_st[l] = h_new
            c_st[l] = c_new
            out_seq[l][t] = h_new

    for l in range(L):
        h_out_ref[l] = h_st[l].astype(h_out_ref.dtype)
        c_out_ref[l] = c_st[l].astype(c_out_ref.dtype)

    # ---- output projection: ONE bulk matmul + ONE bulk store (deferred);
    # top-layer sequence accumulated in vregs, no scratch round-trip.
    top = jnp.concatenate(out_seq[L - 1], axis=0)                # (T*B, H)
    pred = jnp.dot(top, wo_ref[...],
                   preferred_element_type=jnp.float32) + bo_ref[...]
    pred_ref[...] = pred.astype(pred_ref.dtype)


# -------------------------------- wrapper ------------------------------------
@jax.jit
def decoder_forward(x, h0, c0, params):
    T, B, D = x.shape
    L, _, H = h0.shape
    E = params["we"].shape[1]

    x_flat = x.reshape(T * B, D)    # keep kernel-side arrays flat (no in-kernel reshape)

    wih = params["wih"]             # (L, E, 4H)
    whh = params["whh"]             # (L, H, 4H)
    if L > 1:
        # Pre-concatenated [wih[l]; whh[l]] for layers >= 1: one fused per-step
        # (B, E+H) x (E+H, 4H) matmul in the wavefront recurrence.
        wfu = jnp.concatenate([wih[1:], whh[1:]], axis=1)        # (L-1, E+H, 4H)
    else:
        wfu = jnp.zeros((1, E + H, 4 * H), jnp.float32)          # unused placeholder

    vmem = pl.BlockSpec(memory_space=pltpu.MemorySpace.VMEM)
    inputs = (x_flat, h0, c0,
              params["we"], params["be"],
              wih[0], whh[0], wfu, params["b"],
              params["wo"], params["bo"])

    pred_flat, h_out, c_out = pl.pallas_call(
        decoder_kernel,
        out_shape=(
            jax.ShapeDtypeStruct((T * B, D), jnp.float32),
            jax.ShapeDtypeStruct((L, B, H), jnp.float32),
            jax.ShapeDtypeStruct((L, B, H), jnp.float32),
        ),
        in_specs=[vmem] * len(inputs),
        out_specs=(vmem, vmem, vmem),
    )(*inputs)
    return pred_flat.reshape(T, B, D), h_out, c_out


# --------------------------- pure-JAX reference -------------------------------
def decoder_reference(x, h0, c0, p):
    T, B, _ = x.shape
    L, _, H = h0.shape
    emb = jnp.maximum(jnp.einsum("tbd,de->tbe", x, p["we"]) + p["be"][0], 0.0)

    h = [h0[l] for l in range(L)]
    c = [c0[l] for l in range(L)]
    preds = []
    for t in range(T):
        inp = emb[t]
        for l in range(L):
            gates = inp @ p["wih"][l] + h[l] @ p["whh"][l] + p["b"][l, 0]
            i_g = jax.nn.sigmoid(gates[:, 0 * H:1 * H])
            f_g = jax.nn.sigmoid(gates[:, 1 * H:2 * H])
            g_g = jnp.tanh(gates[:, 2 * H:3 * H])
            o_g = jax.nn.sigmoid(gates[:, 3 * H:4 * H])
            c[l] = f_g * c[l] + i_g * g_g
            h[l] = o_g * jnp.tanh(c[l])
            inp = h[l]
        preds.append(inp @ p["wo"] + p["bo"][0])
    return jnp.stack(preds), jnp.stack(h), jnp.stack(c)


# ----------------------------- parameter init ---------------------------------
def init_params(key):
    ks = jax.random.split(key, 8)
    D, E, H, L = OUTPUT_DIM, EMBEDDING_DIM, HIDDEN_DIM, NUM_LAYERS
    scale = 0.1
    return {
        # embedding Linear(D -> E)
        "we": scale * jax.random.normal(ks[0], (D, E), jnp.float32),
        "be": scale * jax.random.normal(ks[1], (1, E), jnp.float32),
        # LSTM: stacked per-layer weights (layer 0 input dim == E == H)
        "wih": scale * jax.random.normal(ks[2], (L, E, 4 * H), jnp.float32),
        "whh": scale * jax.random.normal(ks[3], (L, H, 4 * H), jnp.float32),
        # single fused bias per layer == PyTorch's b_ih + b_hh; init 0 (matches
        # init_weights: bias.fill_(0))
        "b": jnp.zeros((L, 1, 4 * H), jnp.float32),
        # output Linear(H -> D)
        "wo": scale * jax.random.normal(ks[4], (H, D), jnp.float32),
        "bo": scale * jax.random.normal(ks[5], (1, D), jnp.float32),
    }


# ----------------------------------- main -------------------------------------
if __name__ == "__main__":
    key = jax.random.PRNGKey(0)
    k_x, k_h, k_c, k_p = jax.random.split(key, 4)

    T, B = 8, 8
    x = jax.random.normal(k_x, (T, B, OUTPUT_DIM), jnp.float32)
    h0 = jax.random.normal(k_h, (NUM_LAYERS, B, HIDDEN_DIM), jnp.float32)
    c0 = jax.random.normal(k_c, (NUM_LAYERS, B, HIDDEN_DIM), jnp.float32)
    params = init_params(k_p)

    pred, h_out, c_out = decoder_forward(x, h0, c0, params)
    jax.block_until_ready((pred, h_out, c_out))

    pred_ref, h_ref, c_ref = decoder_reference(x, h0, c0, params)
    assert jnp.allclose(pred, pred_ref, atol=1e-4, rtol=1e-4), "pred mismatch"
    assert jnp.allclose(h_out, h_ref, atol=1e-4, rtol=1e-4), "h mismatch"
    assert jnp.allclose(c_out, c_ref, atol=1e-4, rtol=1e-4), "c mismatch"

    print("KERNEL_OK")
</pallas_src>

<mosaic_0001>
module attributes {stable_mosaic.version = 11 : i64} {
  func.func @decoder_kernel(%arg0: memref<64x16xf32, #tpu.memory_space<vmem>>, %arg1: memref<2x8x32xf32, #tpu.memory_space<vmem>>, %arg2: memref<2x8x32xf32, #tpu.memory_space<vmem>>, %arg3: memref<16x32xf32, #tpu.memory_space<vmem>>, %arg4: memref<1x32xf32, #tpu.memory_space<vmem>>, %arg5: memref<32x128xf32, #tpu.memory_space<vmem>>, %arg6: memref<32x128xf32, #tpu.memory_space<vmem>>, %arg7: memref<1x64x128xf32, #tpu.memory_space<vmem>>, %arg8: memref<2x1x128xf32, #tpu.memory_space<vmem>>, %arg9: memref<32x16xf32, #tpu.memory_space<vmem>>, %arg10: memref<1x16xf32, #tpu.memory_space<vmem>>, %arg11: memref<64x16xf32, #tpu.memory_space<vmem>>, %arg12: memref<2x8x32xf32, #tpu.memory_space<vmem>>, %arg13: memref<2x8x32xf32, #tpu.memory_space<vmem>>) attributes {dimension_semantics = [], scalar_prefetch = 0 : i64, scratch_operands = 0 : i64, tpu.core_type = #tpu.core_type<tc>} {
    %c0 = arith.constant 0 : index
    %c0_0 = arith.constant 0 : index
    %0 = vector.load %arg0[%c0, %c0_0] : memref<64x16xf32, #tpu.memory_space<vmem>>, vector<64x16xf32>
    %c0_1 = arith.constant 0 : index
    %c0_2 = arith.constant 0 : index
    %1 = vector.load %arg3[%c0_1, %c0_2] : memref<16x32xf32, #tpu.memory_space<vmem>>, vector<16x32xf32>
    %cst = arith.constant dense<0.000000e+00> : vector<64x32xf32>
    %2 = tpu.matmul %0, %1, %cst {dimension_numbers = #tpu.dot_dimension_numbers<[1], [0], [0], [1], [0, 0, 1, 1], [], []>} : vector<64x16xf32>, vector<16x32xf32>, vector<64x32xf32> -> vector<64x32xf32>
    %c0_3 = arith.constant 0 : index
    %c0_4 = arith.constant 0 : index
    %3 = vector.load %arg4[%c0_3, %c0_4] : memref<1x32xf32, #tpu.memory_space<vmem>>, vector<1x32xf32>
    %4 = vector.broadcast %3 : vector<1x32xf32> to vector<64x32xf32>
    %5 = arith.addf %2, %4 : vector<64x32xf32>
    %cst_5 = arith.constant 0.000000e+00 : f32
    %6 = vector.broadcast %cst_5 : f32 to vector<64x32xf32>
    %7 = arith.maximumf %5, %6 : vector<64x32xf32>
    %c0_6 = arith.constant 0 : index
    %c0_7 = arith.constant 0 : index
    %8 = vector.load %arg5[%c0_6, %c0_7] : memref<32x128xf32, #tpu.memory_space<vmem>>, vector<32x128xf32>
    %cst_8 = arith.constant dense<0.000000e+00> : vector<64x128xf32>
    %9 = tpu.matmul %7, %8, %cst_8 {dimension_numbers = #tpu.dot_dimension_numbers<[1], [0], [0], [1], [0, 0, 1, 1], [], []>} : vector<64x32xf32>, vector<32x128xf32>, vector<64x128xf32> -> vector<64x128xf32>
    %c0_9 = arith.constant 0 : index
    %c0_10 = arith.constant 0 : index
    %c0_11 = arith.constant 0 : index
    %10 = vector.load %arg8[%c0_9, %c0_10, %c0_11] : memref<2x1x128xf32, #tpu.memory_space<vmem>>, vector<1x1x128xf32>
    %11 = vector.shape_cast %10 : vector<1x1x128xf32> to vector<1x128xf32>
    %12 = vector.broadcast %11 : vector<1x128xf32> to vector<64x128xf32>
    %13 = arith.addf %9, %12 : vector<64x128xf32>
    %c0_12 = arith.constant 0 : index
    %c0_13 = arith.constant 0 : index
    %14 = vector.load %arg6[%c0_12, %c0_13] : memref<32x128xf32, #tpu.memory_space<vmem>>, vector<32x128xf32>
    %c0_14 = arith.constant 0 : index
    %c0_15 = arith.constant 0 : index
    %c0_16 = arith.constant 0 : index
    %15 = vector.load %arg7[%c0_14, %c0_15, %c0_16] : memref<1x64x128xf32, #tpu.memory_space<vmem>>, vector<1x64x128xf32>
    %16 = vector.shape_cast %15 : vector<1x64x128xf32> to vector<64x128xf32>
    %c1 = arith.constant 1 : index
    %c0_17 = arith.constant 0 : index
    %c0_18 = arith.constant 0 : index
    %17 = vector.load %arg8[%c1, %c0_17, %c0_18] : memref<2x1x128xf32, #tpu.memory_space<vmem>>, vector<1x1x128xf32>
    %18 = vector.shape_cast %17 : vector<1x1x128xf32> to vector<1x128xf32>
    %19 = vector.shape_cast %18 : vector<1x128xf32> to vector<1x128xf32>
    %20 = vector.broadcast %19 : vector<1x128xf32> to vector<8x128xf32>
    %c0_19 = arith.constant 0 : index
    %c0_20 = arith.constant 0 : index
    %c0_21 = arith.constant 0 : index
    %21 = vector.load %arg1[%c0_19, %c0_20, %c0_21] : memref<2x8x32xf32, #tpu.memory_space<vmem>>, vector<1x8x32xf32>
    %22 = vector.shape_cast %21 : vector<1x8x32xf32> to vector<8x32xf32>
    %c1_22 = arith.constant 1 : index
    %c0_23 = arith.constant 0 : index
    %c0_24 = arith.constant 0 : index
    %23 = vector.load %arg1[%c1_22, %c0_23, %c0_24] : memref<2x8x32xf32, #tpu.memory_space<vmem>>, vector<1x8x32xf32>
    %24 = vector.shape_cast %23 : vector<1x8x32xf32> to vector<8x32xf32>
    %c0_25 = arith.constant 0 : index
    %c0_26 = arith.constant 0 : index
    %c0_27 = arith.constant 0 : index
    %25 = vector.load %arg2[%c0_25, %c0_26, %c0_27] : memref<2x8x32xf32, #tpu.memory_space<vmem>>, vector<1x8x32xf32>
    %26 = vector.shape_cast %25 : vector<1x8x32xf32> to vector<8x32xf32>
    %c1_28 = arith.constant 1 : index
    %c0_29 = arith.constant 0 : index
    %c0_30 = arith.constant 0 : index
    %27 = vector.load %arg2[%c1_28, %c0_29, %c0_30] : memref<2x8x32xf32, #tpu.memory_space<vmem>>, vector<1x8x32xf32>
    %28 = vector.shape_cast %27 : vector<1x8x32xf32> to vector<8x32xf32>
    %29 = vector.extract_strided_slice %13 {offsets = [0, 0], sizes = [8, 128], strides = [1, 1]} : vector<64x128xf32> to vector<8x128xf32>
    %cst_31 = arith.constant dense<0.000000e+00> : vector<8x128xf32>
    %30 = tpu.matmul %22, %14, %cst_31 {dimension_numbers = #tpu.dot_dimension_numbers<[1], [0], [0], [1], [0, 0, 1, 1], [], []>} : vector<8x32xf32>, vector<32x128xf32>, vector<8x128xf32> -> vector<8x128xf32>
    %31 = arith.addf %29, %30 : vector<8x128xf32>
    %32 = arith.negf %31 : vector<8x128xf32>
    %33 = math.exp %32 : vector<8x128xf32>
    %cst_32 = arith.constant 1.000000e+00 : f32
    %34 = vector.broadcast %cst_32 : f32 to vector<8x128xf32>
    %35 = arith.addf %34, %33 : vector<8x128xf32>
    %36 = arith.divf %34, %35 : vector<8x128xf32>
    %37 = math.tanh %31 : vector<8x128xf32>
    %38 = vector.extract_strided_slice %36 {offsets = [0, 0], sizes = [8, 32], strides = [1, 1]} : vector<8x128xf32> to vector<8x32xf32>
    %39 = vector.extract_strided_slice %36 {offsets = [0, 32], sizes = [8, 32], strides = [1, 1]} : vector<8x128xf32> to vector<8x32xf32>
    %40 = vector.extract_strided_slice %37 {offsets = [0, 64], sizes = [8, 32], strides = [1, 1]} : vector<8x128xf32> to vector<8x32xf32>
    %41 = vector.extract_strided_slice %36 {offsets = [0, 96], sizes = [8, 32], strides = [1, 1]} : vector<8x128xf32> to vector<8x32xf32>
    %42 = arith.mulf %39, %26 : vector<8x32xf32>
    %43 = arith.mulf %38, %40 : vector<8x32xf32>
    %44 = arith.addf %42, %43 : vector<8x32xf32>
    %45 = math.tanh %44 : vector<8x32xf32>
    %46 = arith.mulf %41, %45 : vector<8x32xf32>
    %47 = vector.extract_strided_slice %13 {offsets = [8, 0], sizes = [8, 128], strides = [1, 1]} : vector<64x128xf32> to vector<8x128xf32>
    %cst_33 = arith.constant dense<0.000000e+00> : vector<8x128xf32>
    %48 = tpu.matmul %46, %14, %cst_33 {dimension_numbers = #tpu.dot_dimension_numbers<[1], [0], [0], [1], [0, 0, 1, 1], [], []>} : vector<8x32xf32>, vector<32x128xf32>, vector<8x128xf32> -> vector<8x128xf32>
    %49 = arith.addf %47, %48 : vector<8x128xf32>
    %50 = arith.negf %49 : vector<8x128xf32>
    %51 = math.exp %50 : vector<8x128xf32>
    %cst_34 = arith.constant 1.000000e+00 : f32
    %52 = vector.broadcast %cst_34 : f32 to vector<8x128xf32>
    %53 = arith.addf %52, %51 : vector<8x128xf32>
    %54 = arith.divf %52, %53 : vector<8x128xf32>
    %55 = math.tanh %49 : vector<8x128xf32>
    %56 = vector.extract_strided_slice %54 {offsets = [0, 0], sizes = [8, 32], strides = [1, 1]} : vector<8x128xf32> to vector<8x32xf32>
    %57 = vector.extract_strided_slice %54 {offsets = [0, 32], sizes = [8, 32], strides = [1, 1]} : vector<8x128xf32> to vector<8x32xf32>
    %58 = vector.extract_strided_slice %55 {offsets = [0, 64], sizes = [8, 32], strides = [1, 1]} : vector<8x128xf32> to vector<8x32xf32>
    %59 = vector.extract_strided_slice %54 {offsets = [0, 96], sizes = [8, 32], strides = [1, 1]} : vector<8x128xf32> to vector<8x32xf32>
    %60 = arith.mulf %57, %44 : vector<8x32xf32>
    %61 = arith.mulf %56, %58 : vector<8x32xf32>
    %62 = arith.addf %60, %61 : vector<8x32xf32>
    %63 = math.tanh %62 : vector<8x32xf32>
    %64 = arith.mulf %59, %63 : vector<8x32xf32>
    %65 = tpu.concatenate %46, %24 in 1 : vector<8x32xf32>, vector<8x32xf32> -> vector<8x64xf32>
    %cst_35 = arith.constant dense<0.000000e+00> : vector<8x128xf32>
    %66 = tpu.matmul %65, %16, %cst_35 {dimension_numbers = #tpu.dot_dimension_numbers<[1], [0], [0], [1], [0, 0, 1, 1], [], []>} : vector<8x64xf32>, vector<64x128xf32>, vector<8x128xf32> -> vector<8x128xf32>
    %67 = arith.addf %66, %20 : vector<8x128xf32>
    %68 = arith.negf %67 : vector<8x128xf32>
    %69 = math.exp %68 : vector<8x128xf32>
    %cst_36 = arith.constant 1.000000e+00 : f32
    %70 = vector.broadcast %cst_36 : f32 to vector<8x128xf32>
    %71 = arith.addf %70, %69 : vector<8x128xf32>
    %72 = arith.divf %70, %71 : vector<8x128xf32>
    %73 = math.tanh %67 : vector<8x128xf32>
    %74 = vector.extract_strided_slice %72 {offsets = [0, 0], sizes = [8, 32], strides = [1, 1]} : vector<8x128xf32> to vector<8x32xf32>
    %75 = vector.extract_strided_slice %72 {offsets = [0, 32], sizes = [8, 32], strides = [1, 1]} : vector<8x128xf32> to vector<8x32xf32>
    %76 = vector.extract_strided_slice %73 {offsets = [0, 64], sizes = [8, 32], strides = [1, 1]} : vector<8x128xf32> to vector<8x32xf32>
    %77 = vector.extract_strided_slice %72 {offsets = [0, 96], sizes = [8, 32], strides = [1, 1]} : vector<8x128xf32> to vector<8x32xf32>
    %78 = arith.mulf %75, %28 : vector<8x32xf32>
    %79 = arith.mulf %74, %76 : vector<8x32xf32>
    %80 = arith.addf %78, %79 : vector<8x32xf32>
    %81 = math.tanh %80 : vector<8x32xf32>
    %82 = arith.mulf %77, %81 : vector<8x32xf32>
    %83 = vector.extract_strided_slice %13 {offsets = [16, 0], sizes = [8, 128], strides = [1, 1]} : vector<64x128xf32> to vector<8x128xf32>
    %cst_37 = arith.constant dense<0.000000e+00> : vector<8x128xf32>
    %84 = tpu.matmul %64, %14, %cst_37 {dimension_numbers = #tpu.dot_dimension_numbers<[1], [0], [0], [1], [0, 0, 1, 1], [], []>} : vector<8x32xf32>, vector<32x128xf32>, vector<8x128xf32> -> vector<8x128xf32>
    %85 = arith.addf %83, %84 : vector<8x128xf32>
    %86 = arith.negf %85 : vector<8x128xf32>
    %87 = math.exp %86 : vector<8x128xf32>
    %cst_38 = arith.constant 1.000000e+00 : f32
    %88 = vector.broadcast %cst_38 : f32 to vector<8x128xf32>
    %89 = arith.addf %88, %87 : vector<8x128xf32>
    %90 = arith.divf %88, %89 : vector<8x128xf32>
    %91 = math.tanh %85 : vector<8x128xf32>
    %92 = vector.extract_strided_slice %90 {offsets = [0, 0], sizes = [8, 32], strides = [1, 1]} : vector<8x128xf32> to vector<8x32xf32>
    %93 = vector.extract_strided_slice %90 {offsets = [0, 32], sizes = [8, 32], strides = [1, 1]} : vector<8x128xf32> to vector<8x32xf32>
    %94 = vector.extract_strided_slice %91 {offsets = [0, 64], sizes = [8, 32], strides = [1, 1]} : vector<8x128xf32> to vector<8x32xf32>
    %95 = vector.extract_strided_slice %90 {offsets = [0, 96], sizes = [8, 32], strides = [1, 1]} : vector<8x128xf32> to vector<8x32xf32>
    %96 = arith.mulf %93, %62 : vector<8x32xf32>
    %97 = arith.mulf %92, %94 : vector<8x32xf32>
    %98 = arith.addf %96, %97 : vector<8x32xf32>
    %99 = math.tanh %98 : vector<8x32xf32>
    %100 = arith.mulf %95, %99 : vector<8x32xf32>
    %101 = tpu.concatenate %64, %82 in 1 : vector<8x32xf32>, vector<8x32xf32> -> vector<8x64xf32>
    %cst_39 = arith.constant dense<0.000000e+00> : vector<8x128xf32>
    %102 = tpu.matmul %101, %16, %cst_39 {dimension_numbers = #tpu.dot_dimension_numbers<[1], [0], [0], [1], [0, 0, 1, 1], [], []>} : vector<8x64xf32>, vector<64x128xf32>, vector<8x128xf32> -> vector<8x128xf32>
    %103 = arith.addf %102, %20 : vector<8x128xf32>
    %104 = arith.negf %103 : vector<8x128xf32>
    %105 = math.exp %104 : vector<8x128xf32>
    %cst_40 = arith.constant 1.000000e+00 : f32
    %106 = vector.broadcast %cst_40 : f32 to vector<8x128xf32>
    %107 = arith.addf %106, %105 : vector<8x128xf32>
    %108 = arith.divf %106, %107 : vector<8x128xf32>
    %109 = math.tanh %103 : vector<8x128xf32>
    %110 = vector.extract_strided_slice %108 {offsets = [0, 0], sizes = [8, 32], strides = [1, 1]} : vector<8x128xf32> to vector<8x32xf32>
    %111 = vector.extract_strided_slice %108 {offsets = [0, 32], sizes = [8, 32], strides = [1, 1]} : vector<8x128xf32> to vector<8x32xf32>
    %112 = vector.extract_strided_slice %109 {offsets = [0, 64], sizes = [8, 32], strides = [1, 1]} : vector<8x128xf32> to vector<8x32xf32>
    %113 = vector.extract_strided_slice %108 {offsets = [0, 96], sizes = [8, 32], strides = [1, 1]} : vector<8x128xf32> to vector<8x32xf32>
    %114 = arith.mulf %111, %80 : vector<8x32xf32>
    %115 = arith.mulf %110, %112 : vector<8x32xf32>
    %116 = arith.addf %114, %115 : vector<8x32xf32>
    %117 = math.tanh %116 : vector<8x32xf32>
    %118 = arith.mulf %113, %117 : vector<8x32xf32>
    %119 = vector.extract_strided_slice %13 {offsets = [24, 0], sizes = [8, 128], strides = [1, 1]} : vector<64x128xf32> to vector<8x128xf32>
    %cst_41 = arith.constant dense<0.000000e+00> : vector<8x128xf32>
    %120 = tpu.matmul %100, %14, %cst_41 {dimension_numbers = #tpu.dot_dimension_numbers<[1], [0], [0], [1], [0, 0, 1, 1], [], []>} : vector<8x32xf32>, vector<32x128xf32>, vector<8x128xf32> -> vector<8x128xf32>
    %121 = arith.addf %119, %120 : vector<8x128xf32>
    %122 = arith.negf %121 : vector<8x128xf32>
    %123 = math.exp %122 : vector<8x128xf32>
    %cst_42 = arith.constant 1.000000e+00 : f32
    %124 = vector.broadcast %cst_42 : f32 to vector<8x128xf32>
    %125 = arith.addf %124, %123 : vector<8x128xf32>
    %126 = arith.divf %124, %125 : vector<8x128xf32>
    %127 = math.tanh %121 : vector<8x128xf32>
    %128 = vector.extract_strided_slice %126 {offsets = [0, 0], sizes = [8, 32], strides = [1, 1]} : vector<8x128xf32> to vector<8x32xf32>
    %129 = vector.extract_strided_slice %126 {offsets = [0, 32], sizes = [8, 32], strides = [1, 1]} : vector<8x128xf32> to vector<8x32xf32>
    %130 = vector.extract_strided_slice %127 {offsets = [0, 64], sizes = [8, 32], strides = [1, 1]} : vector<8x128xf32> to vector<8x32xf32>
    %131 = vector.extract_strided_slice %126 {offsets = [0, 96], sizes = [8, 32], strides = [1, 1]} : vector<8x128xf32> to vector<8x32xf32>
    %132 = arith.mulf %129, %98 : vector<8x32xf32>
    %133 = arith.mulf %128, %130 : vector<8x32xf32>
    %134 = arith.addf %132, %133 : vector<8x32xf32>
    %135 = math.tanh %134 : vector<8x32xf32>
    %136 = arith.mulf %131, %135 : vector<8x32xf32>
    %137 = tpu.concatenate %100, %118 in 1 : vector<8x32xf32>, vector<8x32xf32> -> vector<8x64xf32>
    %cst_43 = arith.constant dense<0.000000e+00> : vector<8x128xf32>
    %138 = tpu.matmul %137, %16, %cst_43 {dimension_numbers = #tpu.dot_dimension_numbers<[1], [0], [0], [1], [0, 0, 1, 1], [], []>} : vector<8x64xf32>, vector<64x128xf32>, vector<8x128xf32> -> vector<8x128xf32>
    %139 = arith.addf %138, %20 : vector<8x128xf32>
    %140 = arith.negf %139 : vector<8x128xf32>
    %141 = math.exp %140 : vector<8x128xf32>
    %cst_44 = arith.constant 1.000000e+00 : f32
    %142 = vector.broadcast %cst_44 : f32 to vector<8x128xf32>
    %143 = arith.addf %142, %141 : vector<8x128xf32>
    %144 = arith.divf %142, %143 : vector<8x128xf32>
    %145 = math.tanh %139 : vector<8x128xf32>
    %146 = vector.extract_strided_slice %144 {offsets = [0, 0], sizes = [8, 32], strides = [1, 1]} : vector<8x128xf32> to vector<8x32xf32>
    %147 = vector.extract_strided_slice %144 {offsets = [0, 32], sizes = [8, 32], strides = [1, 1]} : vector<8x128xf32> to vector<8x32xf32>
    %148 = vector.extract_strided_slice %145 {offsets = [0, 64], sizes = [8, 32], strides = [1, 1]} : vector<8x128xf32> to vector<8x32xf32>
    %149 = vector.extract_strided_slice %144 {offsets = [0, 96], sizes = [8, 32], strides = [1, 1]} : vector<8x128xf32> to vector<8x32xf32>
    %150 = arith.mulf %147, %116 : vector<8x32xf32>
    %151 = arith.mulf %146, %148 : vector<8x32xf32>
    %152 = arith.addf %150, %151 : vector<8x32xf32>
    %153 = math.tanh %152 : vector<8x32xf32>
    %154 = arith.mulf %149, %153 : vector<8x32xf32>
    %155 = vector.extract_strided_slice %13 {offsets = [32, 0], sizes = [8, 128], strides = [1, 1]} : vector<64x128xf32> to vector<8x128xf32>
    %cst_45 = arith.constant dense<0.000000e+00> : vector<8x128xf32>
    %156 = tpu.matmul %136, %14, %cst_45 {dimension_numbers = #tpu.dot_dimension_numbers<[1], [0], [0], [1], [0, 0, 1, 1], [], []>} : vector<8x32xf32>, vector<32x128xf32>, vector<8x128xf32> -> vector<8x128xf32>
    %157 = arith.addf %155, %156 : vector<8x128xf32>
    %158 = arith.negf %157 : vector<8x128xf32>
    %159 = math.exp %158 : vector<8x128xf32>
    %cst_46 = arith.constant 1.000000e+00 : f32
    %160 = vector.broadcast %cst_46 : f32 to vector<8x128xf32>
    %161 = arith.addf %160, %159 : vector<8x128xf32>
    %162 = arith.divf %160, %161 : vector<8x128xf32>
    %163 = math.tanh %157 : vector<8x128xf32>
    %164 = vector.extract_strided_slice %162 {offsets = [0, 0], sizes = [8, 32], strides = [1, 1]} : vector<8x128xf32> to vector<8x32xf32>
    %165 = vector.extract_strided_slice %162 {offsets = [0, 32], sizes = [8, 32], strides = [1, 1]} : vector<8x128xf32> to vector<8x32xf32>
    %166 = vector.extract_strided_slice %163 {offsets = [0, 64], sizes = [8, 32], strides = [1, 1]} : vector<8x128xf32> to vector<8x32xf32>
    %167 = vector.extract_strided_slice %162 {offsets = [0, 96], sizes = [8, 32], strides = [1, 1]} : vector<8x128xf32> to vector<8x32xf32>
    %168 = arith.mulf %165, %134 : vector<8x32xf32>
    %169 = arith.mulf %164, %166 : vector<8x32xf32>
    %170 = arith.addf %168, %169 : vector<8x32xf32>
    %171 = math.tanh %170 : vector<8x32xf32>
    %172 = arith.mulf %167, %171 : vector<8x32xf32>
    %173 = tpu.concatenate %136, %154 in 1 : vector<8x32xf32>, vector<8x32xf32> -> vector<8x64xf32>
    %cst_47 = arith.constant dense<0.000000e+00> : vector<8x128xf32>
    %174 = tpu.matmul %173, %16, %cst_47 {dimension_numbers = #tpu.dot_dimension_numbers<[1], [0], [0], [1], [0, 0, 1, 1], [], []>} : vector<8x64xf32>, vector<64x128xf32>, vector<8x128xf32> -> vector<8x128xf32>
    %175 = arith.addf %174, %20 : vector<8x128xf32>
    %176 = arith.negf %175 : vector<8x128xf32>
    %177 = math.exp %176 : vector<8x128xf32>
    %cst_48 = arith.constant 1.000000e+00 : f32
    %178 = vector.broadcast %cst_48 : f32 to vector<8x128xf32>
    %179 = arith.addf %178, %177 : vector<8x128xf32>
    %180 = arith.divf %178, %179 : vector<8x128xf32>
    %181 = math.tanh %175 : vector<8x128xf32>
    %182 = vector.extract_strided_slice %180 {offsets = [0, 0], sizes = [8, 32], strides = [1, 1]} : vector<8x128xf32> to vector<8x32xf32>
    %183 = vector.extract_strided_slice %180 {offsets = [0, 32], sizes = [8, 32], strides = [1, 1]} : vector<8x128xf32> to vector<8x32xf32>
    %184 = vector.extract_strided_slice %181 {offsets = [0, 64], sizes = [8, 32], strides = [1, 1]} : vector<8x128xf32> to vector<8x32xf32>
    %185 = vector.extract_strided_slice %180 {offsets = [0, 96], sizes = [8, 32], strides = [1, 1]} : vector<8x128xf32> to vector<8x32xf32>
    %186 = arith.mulf %183, %152 : vector<8x32xf32>
    %187 = arith.mulf %182, %184 : vector<8x32xf32>
    %188 = arith.addf %186, %187 : vector<8x32xf32>
    %189 = math.tanh %188 : vector<8x32xf32>
    %190 = arith.mulf %185, %189 : vector<8x32xf32>
    %191 = vector.extract_strided_slice %13 {offsets = [40, 0], sizes = [8, 128], strides = [1, 1]} : vector<64x128xf32> to vector<8x128xf32>
    %cst_49 = arith.constant dense<0.000000e+00> : vector<8x128xf32>
    %192 = tpu.matmul %172, %14, %cst_49 {dimension_numbers = #tpu.dot_dimension_numbers<[1], [0], [0], [1], [0, 0, 1, 1], [], []>} : vector<8x32xf32>, vector<32x128xf32>, vector<8x128xf32> -> vector<8x128xf32>
    %193 = arith.addf %191, %192 : vector<8x128xf32>
    %194 = arith.negf %193 : vector<8x128xf32>
    %195 = math.exp %194 : vector<8x128xf32>
    %cst_50 = arith.constant 1.000000e+00 : f32
    %196 = vector.broadcast %cst_50 : f32 to vector<8x128xf32>
    %197 = arith.addf %196, %195 : vector<8x128xf32>
    %198 = arith.divf %196, %197 : vector<8x128xf32>
    %199 = math.tanh %193 : vector<8x128xf32>
    %200 = vector.extract_strided_slice %198 {offsets = [0, 0], sizes = [8, 32], strides = [1, 1]} : vector<8x128xf32> to vector<8x32xf32>
    %201 = vector.extract_strided_slice %198 {offsets = [0, 32], sizes = [8, 32], strides = [1, 1]} : vector<8x128xf32> to vector<8x32xf32>
    %202 = vector.extract_strided_slice %199 {offsets = [0, 64], sizes = [8, 32], strides = [1, 1]} : vector<8x128xf32> to vector<8x32xf32>
    %203 = vector.extract_strided_slice %198 {offsets = [0, 96], sizes = [8, 32], strides = [1, 1]} : vector<8x128xf32> to vector<8x32xf32>
    %204 = arith.mulf %201, %170 : vector<8x32xf32>
    %205 = arith.mulf %200, %202 : vector<8x32xf32>
    %206 = arith.addf %204, %205 : vector<8x32xf32>
    %207 = math.tanh %206 : vector<8x32xf32>
    %208 = arith.mulf %203, %207 : vector<8x32xf32>
    %209 = tpu.concatenate %172, %190 in 1 : vector<8x32xf32>, vector<8x32xf32> -> vector<8x64xf32>
    %cst_51 = arith.constant dense<0.000000e+00> : vector<8x128xf32>
    %210 = tpu.matmul %209, %16, %cst_51 {dimension_numbers = #tpu.dot_dimension_numbers<[1], [0], [0], [1], [0, 0, 1, 1], [], []>} : vector<8x64xf32>, vector<64x128xf32>, vector<8x128xf32> -> vector<8x128xf32>
    %211 = arith.addf %210, %20 : vector<8x128xf32>
    %212 = arith.negf %211 : vector<8x128xf32>
    %213 = math.exp %212 : vector<8x128xf32>
    %cst_52 = arith.constant 1.000000e+00 : f32
    %214 = vector.broadcast %cst_52 : f32 to vector<8x128xf32>
    %215 = arith.addf %214, %213 : vector<8x128xf32>
    %216 = arith.divf %214, %215 : vector<8x128xf32>
    %217 = math.tanh %211 : vector<8x128xf32>
    %218 = vector.extract_strided_slice %216 {offsets = [0, 0], sizes = [8, 32], strides = [1, 1]} : vector<8x128xf32> to vector<8x32xf32>
    %219 = vector.extract_strided_slice %216 {offsets = [0, 32], sizes = [8, 32], strides = [1, 1]} : vector<8x128xf32> to vector<8x32xf32>
    %220 = vector.extract_strided_slice %217 {offsets = [0, 64], sizes = [8, 32], strides = [1, 1]} : vector<8x128xf32> to vector<8x32xf32>
    %221 = vector.extract_strided_slice %216 {offsets = [0, 96], sizes = [8, 32], strides = [1, 1]} : vector<8x128xf32> to vector<8x32xf32>
    %222 = arith.mulf %219, %188 : vector<8x32xf32>
    %223 = arith.mulf %218, %220 : vector<8x32xf32>
    %224 = arith.addf %222, %223 : vector<8x32xf32>
    %225 = math.tanh %224 : vector<8x32xf32>
    %226 = arith.mulf %221, %225 : vector<8x32xf32>
    %227 = vector.extract_strided_slice %13 {offsets = [48, 0], sizes = [8, 128], strides = [1, 1]} : vector<64x128xf32> to vector<8x128xf32>
    %cst_53 = arith.constant dense<0.000000e+00> : vector<8x128xf32>
    %228 = tpu.matmul %208, %14, %cst_53 {dimension_numbers = #tpu.dot_dimension_numbers<[1], [0], [0], [1], [0, 0, 1, 1], [], []>} : vector<8x32xf32>, vector<32x128xf32>, vector<8x128xf32> -> vector<8x128xf32>
    %229 = arith.addf %227, %228 : vector<8x128xf32>
    %230 = arith.negf %229 : vector<8x128xf32>
    %231 = math.exp %230 : vector<8x128xf32>
    %cst_54 = arith.constant 1.000000e+00 : f32
    %232 = vector.broadcast %cst_54 : f32 to vector<8x128xf32>
    %233 = arith.addf %232, %231 : vector<8x128xf32>
    %234 = arith.divf %232, %233 : vector<8x128xf32>
    %235 = math.tanh %229 : vector<8x128xf32>
    %236 = vector.extract_strided_slice %234 {offsets = [0, 0], sizes = [8, 32], strides = [1, 1]} : vector<8x128xf32> to vector<8x32xf32>
    %237 = vector.extract_strided_slice %234 {offsets = [0, 32], sizes = [8, 32], strides = [1, 1]} : vector<8x128xf32> to vector<8x32xf32>
    %238 = vector.extract_strided_slice %235 {offsets = [0, 64], sizes = [8, 32], strides = [1, 1]} : vector<8x128xf32> to vector<8x32xf32>
    %239 = vector.extract_strided_slice %234 {offsets = [0, 96], sizes = [8, 32], strides = [1, 1]} : vector<8x128xf32> to vector<8x32xf32>
    %240 = arith.mulf %237, %206 : vector<8x32xf32>
    %241 = arith.mulf %236, %238 : vector<8x32xf32>
    %242 = arith.addf %240, %241 : vector<8x32xf32>
    %243 = math.tanh %242 : vector<8x32xf32>
    %244 = arith.mulf %239, %243 : vector<8x32xf32>
    %245 = tpu.concatenate %208, %226 in 1 : vector<8x32xf32>, vector<8x32xf32> -> vector<8x64xf32>
    %cst_55 = arith.constant dense<0.000000e+00> : vector<8x128xf32>
    %246 = tpu.matmul %245, %16, %cst_55 {dimension_numbers = #tpu.dot_dimension_numbers<[1], [0], [0], [1], [0, 0, 1, 1], [], []>} : vector<8x64xf32>, vector<64x128xf32>, vector<8x128xf32> -> vector<8x128xf32>
    %247 = arith.addf %246, %20 : vector<8x128xf32>
    %248 = arith.negf %247 : vector<8x128xf32>
    %249 = math.exp %248 : vector<8x128xf32>
    %cst_56 = arith.constant 1.000000e+00 : f32
    %250 = vector.broadcast %cst_56 : f32 to vector<8x128xf32>
    %251 = arith.addf %250, %249 : vector<8x128xf32>
    %252 = arith.divf %250, %251 : vector<8x128xf32>
    %253 = math.tanh %247 : vector<8x128xf32>
    %254 = vector.extract_strided_slice %252 {offsets = [0, 0], sizes = [8, 32], strides = [1, 1]} : vector<8x128xf32> to vector<8x32xf32>
    %255 = vector.extract_strided_slice %252 {offsets = [0, 32], sizes = [8, 32], strides = [1, 1]} : vector<8x128xf32> to vector<8x32xf32>
    %256 = vector.extract_strided_slice %253 {offsets = [0, 64], sizes = [8, 32], strides = [1, 1]} : vector<8x128xf32> to vector<8x32xf32>
    %257 = vector.extract_strided_slice %252 {offsets = [0, 96], sizes = [8, 32], strides = [1, 1]} : vector<8x128xf32> to vector<8x32xf32>
    %258 = arith.mulf %255, %224 : vector<8x32xf32>
    %259 = arith.mulf %254, %256 : vector<8x32xf32>
    %260 = arith.addf %258, %259 : vector<8x32xf32>
    %261 = math.tanh %260 : vector<8x32xf32>
    %262 = arith.mulf %257, %261 : vector<8x32xf32>
    %263 = vector.extract_strided_slice %13 {offsets = [56, 0], sizes = [8, 128], strides = [1, 1]} : vector<64x128xf32> to vector<8x128xf32>
    %cst_57 = arith.constant dense<0.000000e+00> : vector<8x128xf32>
    %264 = tpu.matmul %244, %14, %cst_57 {dimension_numbers = #tpu.dot_dimension_numbers<[1], [0], [0], [1], [0, 0, 1, 1], [], []>} : vector<8x32xf32>, vector<32x128xf32>, vector<8x128xf32> -> vector<8x128xf32>
    %265 = arith.addf %263, %264 : vector<8x128xf32>
    %266 = arith.negf %265 : vector<8x128xf32>
    %267 = math.exp %266 : vector<8x128xf32>
    %cst_58 = arith.constant 1.000000e+00 : f32
    %268 = vector.broadcast %cst_58 : f32 to vector<8x128xf32>
    %269 = arith.addf %268, %267 : vector<8x128xf32>
    %270 = arith.divf %268, %269 : vector<8x128xf32>
    %271 = math.tanh %265 : vector<8x128xf32>
    %272 = vector.extract_strided_slice %270 {offsets = [0, 0], sizes = [8, 32], strides = [1, 1]} : vector<8x128xf32> to vector<8x32xf32>
    %273 = vector.extract_strided_slice %270 {offsets = [0, 32], sizes = [8, 32], strides = [1, 1]} : vector<8x128xf32> to vector<8x32xf32>
    %274 = vector.extract_strided_slice %271 {offsets = [0, 64], sizes = [8, 32], strides = [1, 1]} : vector<8x128xf32> to vector<8x32xf32>
    %275 = vector.extract_strided_slice %270 {offsets = [0, 96], sizes = [8, 32], strides = [1, 1]} : vector<8x128xf32> to vector<8x32xf32>
    %276 = arith.mulf %273, %242 : vector<8x32xf32>
    %277 = arith.mulf %272, %274 : vector<8x32xf32>
    %278 = arith.addf %276, %277 : vector<8x32xf32>
    %279 = math.tanh %278 : vector<8x32xf32>
    %280 = arith.mulf %275, %279 : vector<8x32xf32>
    %281 = tpu.concatenate %244, %262 in 1 : vector<8x32xf32>, vector<8x32xf32> -> vector<8x64xf32>
    %cst_59 = arith.constant dense<0.000000e+00> : vector<8x128xf32>
    %282 = tpu.matmul %281, %16, %cst_59 {dimension_numbers = #tpu.dot_dimension_numbers<[1], [0], [0], [1], [0, 0, 1, 1], [], []>} : vector<8x64xf32>, vector<64x128xf32>, vector<8x128xf32> -> vector<8x128xf32>
    %283 = arith.addf %282, %20 : vector<8x128xf32>
    %284 = arith.negf %283 : vector<8x128xf32>
    %285 = math.exp %284 : vector<8x128xf32>
    %cst_60 = arith.constant 1.000000e+00 : f32
    %286 = vector.broadcast %cst_60 : f32 to vector<8x128xf32>
    %287 = arith.addf %286, %285 : vector<8x128xf32>
    %288 = arith.divf %286, %287 : vector<8x128xf32>
    %289 = math.tanh %283 : vector<8x128xf32>
    %290 = vector.extract_strided_slice %288 {offsets = [0, 0], sizes = [8, 32], strides = [1, 1]} : vector<8x128xf32> to vector<8x32xf32>
    %291 = vector.extract_strided_slice %288 {offsets = [0, 32], sizes = [8, 32], strides = [1, 1]} : vector<8x128xf32> to vector<8x32xf32>
    %292 = vector.extract_strided_slice %289 {offsets = [0, 64], sizes = [8, 32], strides = [1, 1]} : vector<8x128xf32> to vector<8x32xf32>
    %293 = vector.extract_strided_slice %288 {offsets = [0, 96], sizes = [8, 32], strides = [1, 1]} : vector<8x128xf32> to vector<8x32xf32>
    %294 = arith.mulf %291, %260 : vector<8x32xf32>
    %295 = arith.mulf %290, %292 : vector<8x32xf32>
    %296 = arith.addf %294, %295 : vector<8x32xf32>
    %297 = math.tanh %296 : vector<8x32xf32>
    %298 = arith.mulf %293, %297 : vector<8x32xf32>
    %299 = tpu.concatenate %280, %298 in 1 : vector<8x32xf32>, vector<8x32xf32> -> vector<8x64xf32>
    %cst_61 = arith.constant dense<0.000000e+00> : vector<8x128xf32>
    %300 = tpu.matmul %299, %16, %cst_61 {dimension_numbers = #tpu.dot_dimension_numbers<[1], [0], [0], [1], [0, 0, 1, 1], [], []>} : vector<8x64xf32>, vector<64x128xf32>, vector<8x128xf32> -> vector<8x128xf32>
    %301 = arith.addf %300, %20 : vector<8x128xf32>
    %302 = arith.negf %301 : vector<8x128xf32>
    %303 = math.exp %302 : vector<8x128xf32>
    %cst_62 = arith.constant 1.000000e+00 : f32
    %304 = vector.broadcast %cst_62 : f32 to vector<8x128xf32>
    %305 = arith.addf %304, %303 : vector<8x128xf32>
    %306 = arith.divf %304, %305 : vector<8x128xf32>
    %307 = math.tanh %301 : vector<8x128xf32>
    %308 = vector.extract_strided_slice %306 {offsets = [0, 0], sizes = [8, 32], strides = [1, 1]} : vector<8x128xf32> to vector<8x32xf32>
    %309 = vector.extract_strided_slice %306 {offsets = [0, 32], sizes = [8, 32], strides = [1, 1]} : vector<8x128xf32> to vector<8x32xf32>
    %310 = vector.extract_strided_slice %307 {offsets = [0, 64], sizes = [8, 32], strides = [1, 1]} : vector<8x128xf32> to vector<8x32xf32>
    %311 = vector.extract_strided_slice %306 {offsets = [0, 96], sizes = [8, 32], strides = [1, 1]} : vector<8x128xf32> to vector<8x32xf32>
    %312 = arith.mulf %309, %296 : vector<8x32xf32>
    %313 = arith.mulf %308, %310 : vector<8x32xf32>
    %314 = arith.addf %312, %313 : vector<8x32xf32>
    %315 = math.tanh %314 : vector<8x32xf32>
    %316 = arith.mulf %311, %315 : vector<8x32xf32>
    %c0_63 = arith.constant 0 : index
    %c0_64 = arith.constant 0 : index
    %c0_65 = arith.constant 0 : index
    %317 = vector.load %arg12[%c0_63, %c0_64, %c0_65] : memref<2x8x32xf32, #tpu.memory_space<vmem>>, vector<1x8x32xf32>
    %318 = vector.shape_cast %317 : vector<1x8x32xf32> to vector<8x32xf32>
    %319 = vector.shape_cast %280 : vector<8x32xf32> to vector<1x8x32xf32>
    tpu.vector_store %arg12[%c0_63, %c0_64, %c0_65], %319 {strides = array<i32>} : memref<2x8x32xf32, #tpu.memory_space<vmem>>, vector<1x8x32xf32>,
    %c0_66 = arith.constant 0 : index
    %c0_67 = arith.constant 0 : index
    %c0_68 = arith.constant 0 : index
    %320 = vector.load %arg13[%c0_66, %c0_67, %c0_68] : memref<2x8x32xf32, #tpu.memory_space<vmem>>, vector<1x8x32xf32>
    %321 = vector.shape_cast %320 : vector<1x8x32xf32> to vector<8x32xf32>
    %322 = vector.shape_cast %278 : vector<8x32xf32> to vector<1x8x32xf32>
    tpu.vector_store %arg13[%c0_66, %c0_67, %c0_68], %322 {strides = array<i32>} : memref<2x8x32xf32, #tpu.memory_space<vmem>>, vector<1x8x32xf32>,
    %c1_69 = arith.constant 1 : index
    %c0_70 = arith.constant 0 : index
    %c0_71 = arith.constant 0 : index
    %323 = vector.load %arg12[%c1_69, %c0_70, %c0_71] : memref<2x8x32xf32, #tpu.memory_space<vmem>>, vector<1x8x32xf32>
    %324 = vector.shape_cast %323 : vector<1x8x32xf32> to vector<8x32xf32>
    %325 = vector.shape_cast %316 : vector<8x32xf32> to vector<1x8x32xf32>
    tpu.vector_store %arg12[%c1_69, %c0_70, %c0_71], %325 {strides = array<i32>} : memref<2x8x32xf32, #tpu.memory_space<vmem>>, vector<1x8x32xf32>,
    %c1_72 = arith.constant 1 : index
    %c0_73 = arith.constant 0 : index
    %c0_74 = arith.constant 0 : index
    %326 = vector.load %arg13[%c1_72, %c0_73, %c0_74] : memref<2x8x32xf32, #tpu.memory_space<vmem>>, vector<1x8x32xf32>
    %327 = vector.shape_cast %326 : vector<1x8x32xf32> to vector<8x32xf32>
    %328 = vector.shape_cast %314 : vector<8x32xf32> to vector<1x8x32xf32>
    tpu.vector_store %arg13[%c1_72, %c0_73, %c0_74], %328 {strides = array<i32>} : memref<2x8x32xf32, #tpu.memory_space<vmem>>, vector<1x8x32xf32>,
    %329 = tpu.concatenate %82, %118, %154, %190, %226, %262, %298, %316 in 0 : vector<8x32xf32>, vector<8x32xf32>, vector<8x32xf32>, vector<8x32xf32>, vector<8x32xf32>, vector<8x32xf32>, vector<8x32xf32>, vector<8x32xf32> -> vector<64x32xf32>
    %c0_75 = arith.constant 0 : index
    %c0_76 = arith.constant 0 : index
    %330 = vector.load %arg9[%c0_75, %c0_76] : memref<32x16xf32, #tpu.memory_space<vmem>>, vector<32x16xf32>
    %cst_77 = arith.constant dense<0.000000e+00> : vector<64x16xf32>
    %331 = tpu.matmul %329, %330, %cst_77 {dimension_numbers = #tpu.dot_dimension_numbers<[1], [0], [0], [1], [0, 0, 1, 1], [], []>} : vector<64x32xf32>, vector<32x16xf32>, vector<64x16xf32> -> vector<64x16xf32>
    %c0_78 = arith.constant 0 : index
    %c0_79 = arith.constant 0 : index
    %332 = vector.load %arg10[%c0_78, %c0_79] : memref<1x16xf32, #tpu.memory_space<vmem>>, vector<1x16xf32>
    %333 = vector.broadcast %332 : vector<1x16xf32> to vector<64x16xf32>
    %334 = arith.addf %331, %333 : vector<64x16xf32>
    %c0_80 = arith.constant 0 : index
    %c0_81 = arith.constant 0 : index
    %335 = vector.load %arg11[%c0_80, %c0_81] : memref<64x16xf32, #tpu.memory_space<vmem>>, vector<64x16xf32>
    tpu.vector_store %arg11[%c0_80, %c0_81], %334 {strides = array<i32>} : memref<64x16xf32, #tpu.memory_space<vmem>>, vector<64x16xf32>,
    return
  }
}

</mosaic_0001>

<bundles_post_ra>
// kernel: decoder_forward.1
= control target key start
LH: loop header
LB: loop body
LE: loop exit
PB: predicated region body
PF: predicated region fallthrough
CT: control target
= control target key end

     0   :  { %19 = vsyncpa [#allocation3], 0  ;;  %vm57_vm0 = vcmask 130048   ;;  %s2304_s0 = inlined_call_operand.vmem [shape: f32[64,16], index: 0, kind: input, shape index: {}]   ;;  %s2305_s1 = inlined_call_operand.vmem [shape: f32[2,8,32], index: 1, kind: input, shape index: {}]   ;;  %s2306_s2 = inlined_call_operand.vmem [shape: f32[2,8,32], index: 2, kind: input, shape index: {}]   ;;  %s2307_s3 = inlined_call_operand.vmem [shape: f32[16,32], index: 3, kind: input, shape index: {}]   ;;  %s2308_s4 = inlined_call_operand.vmem [shape: f32[1,32], index: 4, kind: input, shape index: {}]   ;;  %s2309_s5 = inlined_call_operand.vmem [shape: f32[32,128], index: 5, kind: input, shape index: {}]   ;;  %s2310_s6 = inlined_call_operand.vmem [shape: f32[32,128], index: 6, kind: input, shape index: {}]   ;;  %s2311_s7 = inlined_call_operand.vmem [shape: f32[1,64,128], index: 7, kind: input, shape index: {}]   ;;  %s2312_s8 = inlined_call_operand.vmem [shape: f32[2,1,128], index: 8, kind: input, shape index: {}]   ;;  %s2313_s9 = inlined_call_operand.vmem [shape: f32[32,16], index: 9, kind: input, shape index: {}]   ;;  %s2314_s10 = inlined_call_operand.vmem [shape: f32[1,16], index: 10, kind: input, shape index: {}]   ;;  %s2315_s11 = inlined_call_operand.hbm [shape: f32[64,16], index: 11, kind: output, shape index: {0}]   ;;  %s2316_s12 = inlined_call_operand.hbm [shape: f32[2,8,32], index: 12, kind: output, shape index: {1}]   ;;  %s2317_s13 = inlined_call_operand.hbm [shape: f32[2,8,32], index: 13, kind: output, shape index: {2}]  }
   0x1   :  { %v52_v0 = vld [vmem:[%s2307_s3 + $0x8] sm:$0xff]  ;;  %v51_v1 = vld [vmem:[%s2307_s3] sm:$0xff]  ;;  %v45_v3 = vld [vmem:[%s2304_s0 + $0x10] sm:$0xff] }
   0x2   :  { %96 = vmatpush.msra.mxu0 %v52_v0  ;;  %v43_v2 = vld [vmem:[%s2304_s0] sm:$0xff]  ;;  %1487 = vmatpush.msra.mxu1 %v52_v0  ;;  %v134_v4 = vld [vmem:[%s2309_s5 + $0x18] sm:$0xff]  ;;  %v48_v5 = vld [vmem:[%s2304_s0 + $0x28] sm:$0xff] }
   0x3   :  { %1488 = vmatpush.msra.mxu2 %v52_v0  ;;  %1489 = vmatpush.msra.mxu3 %v52_v0  ;;  %v1812_v6 = vld [vmem:[%s2310_s6 + $0x18] sm:$0xff]  ;;  %v133_v7 = vld [vmem:[%s2309_s5 + $0x10] sm:$0xff]  ;;  %v132_v9 = vld [vmem:[%s2309_s5 + $0x8] sm:$0xff] }
   0x4   :  { %97 = vmatpush.msra.mxu0 %v51_v1  ;;  %1490 = vmatpush.msra.mxu1 %v51_v1  ;;  %v1820_v8 = vld [vmem:[%s2310_s6 + $0x10] sm:$0xff] }
   0x5   :  { %1428 = vmatmul.msk.f32.vlgmr.msra.gmra.mxu0 %vm57_vm0, %v43_v2  ;;  %1430 = vmatmul.msk.f32.vlgmr.msra.gmra.mxu1 %vm57_vm0, %v45_v3 }
   0x6   :  { %176 = vmatpush.msrb.mxu1 %v134_v4  ;;  %1491 = vmatpush.msra.mxu2 %v51_v1 }
   0x7   :  { %1433 = vmatmul.msk.f32.vlgmr.msra.gmra.mxu2 %vm57_vm0, %v48_v5  ;;  %1492 = vmatpush.msra.mxu3 %v51_v1 }
   0x8   :  { %243 = vmatpush.msrb.mxu2 %v1812_v6  ;;  %177 = vmatpush.msrb.mxu1 %v133_v7 }
   0x9   :  { %20 = vsyncpa [#allocation5], 0  ;;  %v1830_v10 = vld [vmem:[%s2310_s6 + $0x8] sm:$0xff]  ;;  %v131_v11 = vld [vmem:[%s2309_s5] sm:$0xff]  ;;  %310 = vmatpush.msrb.mxu3 %v1812_v6  ;;  %vm139_vm1 = vcmask 261120   ;;  %s1711_s26 = smov 64  }
   0xa   :  { %v44_v12 = vld [vmem:[%s2304_s0 + $0x8] sm:$0xff]  ;;  %v46_v13 = vld [vmem:[%s2304_s0 + $0x18] sm:$0xff]  ;;  %244 = vmatpush.msrb.mxu2 %v1820_v8  ;;  %178 = vmatpush.msrb.mxu1 %v132_v9  ;;  %v1846_v14 = vld [vmem:[%s2310_s6] sm:$0xff]  ;;  %s1712_s29 = smov 32   ;;  %vm362_vm6 = vcmask 523264   ;;  %s1717_s25 = smov [#allocation6]  }
   0xb   :  { %311 = vmatpush.msrb.mxu3 %v1820_v8  ;;  %v49_v15 = vld [vmem:[%s2304_s0 + $0x30] sm:$0xff]  ;;  %v47_v16 = vld [vmem:[%s2304_s0 + $0x20] sm:$0xff]  ;;  %v50_v3 = vld [vmem:[%s2304_s0 + $0x38] sm:$0xff]  ;;  %s1405_s27 = sshll.u32 %s1717_s25, 4  ;;  %s1407_s30 = sshll.u32 %s2317_s13, 4  ;;  %s1406_s27 = int_to_ptr.vmem [resolvable:$true] %s1405_s27  ;;  %s1408_s30 = int_to_ptr.hbm [resolvable:$true] %s1407_s30 }
   0xc   :  { %245 = vmatpush.msrb.mxu2 %v1830_v10  ;;  %179 = vmatpush.msrb.mxu1 %v131_v11  ;;  %v222_v17 = vld [vmem:[%s2305_s1] sm:$0xff]  ;;  %v1908_v4 = vld [vmem:[%s2311_s7 + $0x38] sm:$0xff]  ;;  %v1913_v5 = vld [vmem:[%s2311_s7 + $0x30] sm:$0xff]  ;;  %s1381_s15 = sshll.u32 %s2315_s11, 4  ;;  %s1382_s15 = int_to_ptr.hbm [resolvable:$true] %s1381_s15 }
   0xd   :  { %1429 = vmatmul.msk.f32.gmra.mxu0 %vm57_vm0, %v44_v12  ;;  %1431 = vmatmul.msk.f32.gmra.mxu1 %vm57_vm0, %v46_v13  ;;  %v1870_v18 = vld [vmem:[%s2308_s4] ss:$0 sm:$0xff]  ;;  %v1920_v7 = vld [vmem:[%s2311_s7 + $0x28] sm:$0xff]  ;;  %s1716_s4 = smov 8  }
   0xe   :  { %246 = vmatpush.msrb.mxu2 %v1846_v14  ;;  %312 = vmatpush.msrb.mxu3 %v1830_v10  ;;  %v1889_v40 = vld [vmem:[%s2312_s8] ss:$0 sm:$0xff]  ;;  %v1445_v12 = vld [vmem:[%s2305_s1 + $0x8] sm:$0xff]  ;;  %s1394_s1 = sshll.u32 %s2316_s12, 4  ;;  %s1718_s12 = smov [#allocation2]   ;;  %s1395_s1 = int_to_ptr.hbm [resolvable:$true] %s1394_s1 }
   0xf   :  { %1434 = vmatmul.msk.f32.gmra.mxu2 %vm57_vm0, %v49_v15  ;;  %v225_v46 = vld [vmem:[%s2306_s2] sm:$0xff]  ;;  %1435 = vmatmul.msk.f32.vlgmr.msra.gmra.mxu3 %vm57_vm0, %v50_v3  ;;  %v1948_v15 = vld [vmem:[%s2311_s7 + $0x18] sm:$0xff]  ;;  %s1379_s13 = sshll.u32 %s1718_s12, 4  ;;  %s1380_s13 = int_to_ptr.vmem [resolvable:$true] %s1379_s13 }
  0x10   :  { %313 = vmatpush.msrb.mxu3 %v1846_v14  ;;  %374 = vmatpush.msra.mxu2 %v1908_v4  ;;  %v1942_v13 = vld [vmem:[%s2311_s7 + $0x20] sm:$0xff] }
  0x11   :  { %894 = vmatpush.msrb.mxu0 %v1908_v4  ;;  %1023 = vmatpush.msra.mxu1 %v1908_v4 }
  0x12   :  { %444 = vmatpush.msra.mxu3 %v1812_v6  ;;  %375 = vmatpush.msra.mxu2 %v1913_v5 }
  0x13   :  { %895 = vmatpush.msrb.mxu0 %v1913_v5  ;;  %1024 = vmatpush.msra.mxu1 %v1913_v5 }
  0x14   :  { %445 = vmatpush.msra.mxu3 %v1820_v8  ;;  %376 = vmatpush.msra.mxu2 %v1920_v7 }
  0x15   :  { %1432 = vmatmul.msk.f32.gmra.mxu1 %vm57_vm0, %v47_v16  ;;  %896 = vmatpush.msrb.mxu0 %v1920_v7  ;;  %v1954_v16 = vld [vmem:[%s2311_s7 + $0x10] sm:$0xff] }
  0x16   :  { %446 = vmatpush.msra.mxu3 %v1830_v10  ;;  %1025 = vmatpush.msra.mxu1 %v1920_v7 }
  0x17   :  { %1447 = vmatmul.msk.f32.vlgmr.msrb.gmra.mxu2 %vm139_vm1, %v222_v17  ;;  %897 = vmatpush.msrb.mxu0 %v1942_v13  ;;  %v1962_v17 = vld [vmem:[%s2311_s7 + $0x8] sm:$0xff] }
  0x18   :  { %447 = vmatpush.msra.mxu3 %v1846_v14  ;;  %377 = vmatpush.msra.mxu2 %v1942_v13 }
  0x19   :  { %1026 = vmatpush.msra.mxu1 %v1942_v13  ;;  %898 = vmatpush.msrb.mxu0 %v1948_v15 }
  0x1a   :  { %378 = vmatpush.msra.mxu2 %v1948_v15 }
  0x1b   :  { %1027 = vmatpush.msra.mxu1 %v1948_v15  ;;  %899 = vmatpush.msrb.mxu0 %v1954_v16 }
  0x1c   :  { %379 = vmatpush.msra.mxu2 %v1954_v16 }
  0x1d   :  { %1028 = vmatpush.msra.mxu1 %v1954_v16  ;;  %900 = vmatpush.msrb.mxu0 %v1962_v17 }
  0x1e   :  { %380 = vmatpush.msra.mxu2 %v1962_v17 }
  0x1f   :  { %1029 = vmatpush.msra.mxu1 %v1962_v17 }
  0x82   :  { %v99_v19 = vpop.f32.mrf.mxu0  ;;  %v105_v22 = vpop.f32.mrf.mxu1 }
  0x83   :  { %v100_v20 = vadd.f32 %v1870_v18, %v99_v19  ;;  %v106_v26 = vadd.f32 %v1870_v18, %v105_v22  ;;  %v1973_v19 = vld [vmem:[%s2311_s7] sm:$0xff] }
  0x84   :  { %381 = vmatpush.msra.mxu2 %v1973_v19  ;;  %901 = vmatpush.msrb.mxu0 %v1973_v19 }
  0x85   :  { %v123_v21 = vmax.f32 %v100_v20, 0.0  ;;  %v125_v28 = vmax.f32 %v106_v26, 0.0  ;;  %1030 = vmatpush.msra.mxu1 %v1973_v19 }
  0x86   :  { %573 = vmatpush.msrb.mxu2 %v1812_v6 }
  0x87   :  { %1436 = vmatmul.msk.f32.vlgmr.msrb.gmra.mxu1 %vm139_vm1, %v123_v21 }
  0x88   :  { %574 = vmatpush.msrb.mxu2 %v1820_v8 }
  0x8a   :  { %v102_v23 = vpop.f32.mrf.mxu0  ;;  %v108_v27 = vpop.f32.mrf.mxu1  ;;  %575 = vmatpush.msrb.mxu2 %v1830_v10 }
  0x8b   :  { %v103_v24 = vadd.f32 %v1870_v18, %v102_v23  ;;  %v109_v29 = vadd.f32 %v1870_v18, %v108_v27  ;;  %v114_v33 = vpop.f32.mrf.mxu2 }
  0x8c   :  { %v115_v35 = vadd.f32 %v1870_v18, %v114_v33  ;;  %576 = vmatpush.msrb.mxu2 %v1846_v14  ;;  %v1446_v33 = vld [vmem:[%s2306_s2 + $0x8] sm:$0xff] }
  0x8d   :  { %v124_v25 = vmax.f32 %v103_v24, 0.0  ;;  %v126_v30 = vmax.f32 %v109_v29, 0.0 }
  0x8e   :  { %v128_v36 = vmax.f32 %v115_v35, 0.0 }
  0x8f   :  { %1437 = vmatmul.msk.f32.gmra.mxu1 %vm139_vm1, %v124_v25 }
  0x92   :  { %v111_v31 = vpop.f32.mrf.mxu1  ;;  %v120_v23 = vpop.f32.mrf.mxu3 }
  0x93   :  { %v112_v32 = vadd.f32 %v1870_v18, %v111_v31  ;;  %v117_v37 = vpop.f32.mrf.mxu2  ;;  %v121_v24 = vadd.f32 %v1870_v18, %v120_v23 }
  0x94   :  { %v118_v38 = vadd.f32 %v1870_v18, %v117_v37  ;;  %v2008_v18 = vld [vmem:[%s2312_s8 + $0x1] ss:$0 sm:$0xff] }
  0x95   :  { %v127_v34 = vmax.f32 %v112_v32, 0.0  ;;  %v130_v25 = vmax.f32 %v121_v24, 0.0 }
  0x96   :  { %v129_v39 = vmax.f32 %v118_v38, 0.0 }
  0x97   :  { %1438 = vmatmul.msk.f32.gmra.mxu1 %vm139_vm1, %v125_v28 }
  0x9b   :  { %v248_v42 = vpop.f32.mrf.mxu2 }
  0x9f   :  { %1439 = vmatmul.msk.f32.gmra.mxu1 %vm139_vm1, %v126_v30 }
  0xa7   :  { %1440 = vmatmul.msk.f32.gmra.mxu1 %vm139_vm1, %v127_v34 }
  0xaf   :  { %1441 = vmatmul.msk.f32.gmra.mxu1 %vm139_vm1, %v128_v36 }
  0xb7   :  { %1442 = vmatmul.msk.f32.gmra.mxu1 %vm139_vm1, %v129_v39 }
  0xbf   :  { %1443 = vmatmul.msk.f32.gmra.mxu1 %vm139_vm1, %v130_v25 }
 0x104   :  { %v181_v41 = vpop.f32.mrf.mxu1 }
 0x105   :  { %v182_v43 = vadd.f32 %v1889_v40, %v181_v41 }
 0x107   :  { %v251_v44 = vadd.f32 %v248_v42, %v182_v43 }
 0x109   :  { %1505 = vtanh.f32 %v251_v44  ;;  %v1448_v47 = vmul.f32 -1.442695, %v251_v44 }
 0x10b   :  { %1507 = vpow2.f32 %v1448_v47 }
 0x10c   :  { %v184_v26 = vpop.f32.mrf.mxu1 }
 0x10d   :  { %v185_v27 = vadd.f32 %v1889_v40, %v184_v26 }
 0x10f   :  { %v1506_v45 = vpop.eup %1505 }
 0x110   :  { %278 = vrot.lane.b32.xlu0 %v1506_v45, %s1711_s26 }
 0x111   :  { %v1508_v48 = vpop.eup %1507 }
 0x112   :  { %v255_v49 = vadd.f32 1.0, %v1508_v48 }
 0x114   :  { %1509 = vrcp.f32 %v255_v49  ;;  %v267_v55 = vand.u32 2147483648, %v255_v49  ;;  %vm261_vm3 = vweird.f32 %v255_v49  ;;  %v265_v56 = vand.u32 2147483647, %v255_v49 }
 0x116   :  { %v268_v58 = vor.u32 1.1754944e-38, %v267_v55  ;;  %vm266_vm5 = vcmp.eq.f32.partialorder %v265_v56, 8.507059e+37 }
 0x118   :  { %273 = vrot.lane.b32.xlu0 %v225_v46, %s1712_s29 }
 0x11a   :  { %v1510_v50 = vpop.eup %1509 }
 0x11b   :  { %v257_v51 = vmul.f32 %v1510_v50, %v255_v49  ;;  %vm262_vm2 = vweird.f32 %v1510_v50 }
 0x11c   :  { %vm263_vm4 = vmor %vm261_vm3, %vm262_vm2 }
 0x11d   :  { %v258_v52 = vsub.f32 1.0, %v257_v51 }
 0x11f   :  { %v259_v53 = vmul.f32 %v1510_v50, %v258_v52 }
 0x121   :  { %v260_v54 = vadd.f32 %v1510_v50, %v259_v53 }
 0x123   :  { %v264_v57 = vsel %vm263_vm4, %v1510_v50, %v260_v54 }
 0x124   :  { %v269_v60 = vsel %vm266_vm5, %v268_v58, %v264_v57 }
 0x182   :  { %v279_v59 = vpop.permute.xlu0 %278 }
 0x183   :  { %v281_v61 = vmul.f32 %v279_v59, %v269_v60 }
 0x185   :  { %283 = vrot.lane.b32.xlu1 %v281_v61, %s1712_s29 }
 0x18a   :  { %v274_v62 = vpop.permute.xlu0 %273 }
 0x18b   :  { %v276_v63 = vmul.f32 %v274_v62, %v269_v60 }
 0x1f7   :  { %v284_v0 = vpop.permute.xlu1 %283 }
 0x1f8   :  { %v1898_v1 = vadd.f32 %v284_v0, %v276_v63 }
 0x1fa   :  { %1511 = vtanh.f32 %v1898_v1 }
 0x200   :  { %v1512_v2 = vpop.eup %1511 }
 0x201   :  { %289 = vrot.lane.b32.xlu1 %v1512_v2, %s1711_s26 }
 0x273   :  { %v290_v9 = vpop.permute.xlu1 %289 }
 0x274   :  { %v292_v11 = vmul.f32 %v290_v9, %v269_v60 }
 0x276   :  { %294 = vrot.lane.b32.xlu2 %v292_v11, %s1712_s29 }
 0x27e   :  { %358 = vrot.lane.b32.xlu2 %v1445_v12, %s1712_s29 }
 0x2d0   :  { %v295_v20 = vpop.permute.xlu2 %294 }
 0x2d1   :  { %1449 = vmatmul.msk.f32.vlgmr.msrb.gmra.mxu3 %vm139_vm1, %v295_v20 }
 0x2d2   :  { %507 = vmatpush.msrb.mxu3 %v1908_v4 }
 0x2d4   :  { %508 = vmatpush.msrb.mxu3 %v1913_v5 }
 0x2d6   :  { %509 = vmatpush.msrb.mxu3 %v1920_v7 }
 0x2d8   :  { %v359_v21 = vpop.permute.xlu2 %358  ;;  %510 = vmatpush.msrb.mxu3 %v1942_v13 }
 0x2d9   :  { %v361_v22 = vsel %vm139_vm1, %v295_v20, %v359_v21 }
 0x2da   :  { %1451 = vmatmul.msk.f32.vlgmr.msra.gmra.mxu2 %vm362_vm6, %v361_v22  ;;  %511 = vmatpush.msrb.mxu3 %v1948_v15 }
 0x2db   :  { %636 = vmatpush.msra.mxu2 %v1908_v4 }
 0x2dc   :  { %512 = vmatpush.msrb.mxu3 %v1954_v16 }
 0x2dd   :  { %637 = vmatpush.msra.mxu2 %v1913_v5 }
 0x2de   :  { %513 = vmatpush.msrb.mxu3 %v1962_v17 }
 0x2df   :  { %638 = vmatpush.msra.mxu2 %v1920_v7 }
 0x2e0   :  { %514 = vmatpush.msrb.mxu3 %v1973_v19 }
 0x2e1   :  { %639 = vmatpush.msra.mxu2 %v1942_v13 }
 0x2e3   :  { %640 = vmatpush.msra.mxu2 %v1948_v15 }
 0x2e5   :  { %641 = vmatpush.msra.mxu2 %v1954_v16 }
 0x2e7   :  { %642 = vmatpush.msra.mxu2 %v1962_v17 }
 0x2e9   :  { %643 = vmatpush.msra.mxu2 %v1973_v19 }
 0x354   :  { %v315_v28 = vpop.f32.mrf.mxu3 }
 0x355   :  { %v318_v29 = vadd.f32 %v315_v28, %v185_v27 }
 0x357   :  { %1513 = vtanh.f32 %v318_v29  ;;  %v1450_v35 = vmul.f32 -1.442695, %v318_v29 }
 0x35d   :  { %v1514_v30 = vpop.eup %1513  ;;  %v383_v31 = vpop.f32.mrf.mxu2 }
 0x35e   :  { %v384_v32 = vadd.f32 %v2008_v18, %v383_v31  ;;  %341 = vrot.lane.b32.xlu0 %v1514_v30, %s1711_s26  ;;  %v187_v31 = vpop.f32.mrf.mxu1 }
 0x360   :  { %1515 = vtanh.f32 %v384_v32  ;;  %v1452_v36 = vmul.f32 -1.442695, %v384_v32  ;;  %v188_v32 = vadd.f32 %v1889_v40, %v187_v31 }
 0x361   :  { %1517 = vpow2.f32 %v1450_v35 }
 0x362   :  { %1519 = vpow2.f32 %v1452_v36 }
 0x366   :  { %v1516_v34 = vpop.eup %1515  ;;  %407 = vrot.lane.b32.xlu0 %v1446_v33, %s1712_s29 }
 0x367   :  { %412 = vrot.lane.b32.xlu1 %v1516_v34, %s1711_s26  ;;  %v1518_v37 = vpop.eup %1517 }
 0x368   :  { %v322_v38 = vadd.f32 1.0, %v1518_v37  ;;  %v1520_v39 = vpop.eup %1519 }
 0x369   :  { %v389_v41 = vadd.f32 1.0, %v1520_v39 }
 0x36a   :  { %1521 = vrcp.f32 %v322_v38  ;;  %v334_v49 = vand.u32 2147483648, %v322_v38  ;;  %vm328_vm8 = vweird.f32 %v322_v38  ;;  %v332_v51 = vand.u32 2147483647, %v322_v38 }
 0x36b   :  { %1523 = vrcp.f32 %v389_v41  ;;  %v401_v59 = vand.u32 2147483648, %v389_v41  ;;  %vm395_vm12 = vweird.f32 %v389_v41  ;;  %v399_v60 = vand.u32 2147483647, %v389_v41 }
 0x36c   :  { %v335_v53 = vor.u32 1.1754944e-38, %v334_v49  ;;  %vm333_vm10 = vcmp.eq.f32.partialorder %v332_v51, 8.507059e+37 }
 0x36d   :  { %v402_v62 = vor.u32 1.1754944e-38, %v401_v59  ;;  %vm400_vm14 = vcmp.eq.f32.partialorder %v399_v60, 8.507059e+37 }
 0x370   :  { %v1522_v42 = vpop.eup %1521 }
 0x371   :  { %v324_v43 = vmul.f32 %v1522_v42, %v322_v38  ;;  %v1524_v45 = vpop.eup %1523  ;;  %vm329_vm7 = vweird.f32 %v1522_v42 }
 0x372   :  { %v391_v47 = vmul.f32 %v1524_v45, %v389_v41  ;;  %vm330_vm9 = vmor %vm328_vm8, %vm329_vm7  ;;  %vm396_vm11 = vweird.f32 %v1524_v45 }
 0x373   :  { %v325_v44 = vsub.f32 1.0, %v324_v43  ;;  %vm397_vm13 = vmor %vm395_vm12, %vm396_vm11 }
 0x374   :  { %v392_v50 = vsub.f32 1.0, %v391_v47 }
 0x375   :  { %v326_v46 = vmul.f32 %v1522_v42, %v325_v44 }
 0x376   :  { %v393_v54 = vmul.f32 %v1524_v45, %v392_v50 }
 0x377   :  { %v327_v48 = vadd.f32 %v1522_v42, %v326_v46 }
 0x378   :  { %v394_v58 = vadd.f32 %v1524_v45, %v393_v54 }
 0x379   :  { %v331_v52 = vsel %vm330_vm9, %v1522_v42, %v327_v48 }
 0x37a   :  { %v336_v56 = vsel %vm333_vm10, %v335_v53, %v331_v52  ;;  %v398_v61 = vsel %vm397_vm13, %v1524_v45, %v394_v58 }
 0x37b   :  { %v403_v63 = vsel %vm400_vm14, %v402_v62, %v398_v61  ;;  %v339_v3 = vmul.f32 %v336_v56, %v1898_v1 }
 0x3d0   :  { %v342_v55 = vpop.permute.xlu0 %341 }
 0x3d1   :  { %v344_v57 = vmul.f32 %v342_v55, %v336_v56 }
 0x3d3   :  { %346 = vrot.lane.b32.xlu2 %v344_v57, %s1712_s29 }
 0x3d8   :  { %v408_v20 = vpop.permute.xlu0 %407 }
 0x3d9   :  { %v413_v0 = vpop.permute.xlu1 %412  ;;  %v410_v21 = vmul.f32 %v408_v20, %v403_v63 }
 0x3da   :  { %v415_v2 = vmul.f32 %v413_v0, %v403_v63 }
 0x3dc   :  { %417 = vrot.lane.b32.xlu1 %v415_v2, %s1712_s29 }
 0x42d   :  { %v347_v9 = vpop.permute.xlu2 %346 }
 0x42e   :  { %v2020_v11 = vadd.f32 %v347_v9, %v339_v3 }
 0x430   :  { %1525 = vtanh.f32 %v2020_v11 }
 0x436   :  { %v1526_v12 = vpop.eup %1525 }
 0x437   :  { %352 = vrot.lane.b32.xlu2 %v1526_v12, %s1711_s26 }
 0x44e   :  { %v418_v22 = vpop.permute.xlu1 %417 }
 0x44f   :  { %v2024_v23 = vadd.f32 %v418_v22, %v410_v21 }
 0x451   :  { %1527 = vtanh.f32 %v2024_v23 }
 0x457   :  { %v1528_v24 = vpop.eup %1527 }
 0x458   :  { %423 = vrot.lane.b32.xlu0 %v1528_v24, %s1711_s26 }
 0x491   :  { %v353_v25 = vpop.permute.xlu2 %352 }
 0x492   :  { %v355_v1 = vmul.f32 %v353_v25, %v336_v56 }
 0x494   :  { %428 = vrot.lane.b32.xlu1 %v355_v1, %s1712_s29 }
 0x4ca   :  { %v424_v26 = vpop.permute.xlu0 %423 }
 0x4cb   :  { %v2029_v27 = vmul.f32 %v424_v26, %v403_v63 }
 0x4cd   :  { %492 = vrot.lane.b32.xlu2 %v2029_v27, %s1711_s26 }
 0x506   :  { %v429_v28 = vpop.permute.xlu1 %428 }
 0x507   :  { %1453 = vmatmul.msk.f32.vlgmr.msra.gmra.mxu3 %vm139_vm1, %v429_v28 }
 0x508   :  { %702 = vmatpush.msra.mxu3 %v1812_v6 }
 0x50a   :  { %703 = vmatpush.msra.mxu3 %v1820_v8 }
 0x50c   :  { %704 = vmatpush.msra.mxu3 %v1830_v10 }
 0x50e   :  { %705 = vmatpush.msra.mxu3 %v1846_v14 }
 0x527   :  { %v493_v29 = vpop.permute.xlu2 %492 }
 0x528   :  { %v495_v30 = vsel %vm139_vm1, %v429_v28, %v493_v29 }
 0x529   :  { %1455 = vmatmul.msk.f32.vlgmr.msrb.gmra.mxu3 %vm362_vm6, %v495_v30 }
 0x52a   :  { %765 = vmatpush.msrb.mxu3 %v1908_v4 }
 0x52c   :  { %766 = vmatpush.msrb.mxu3 %v1913_v5 }
 0x52e   :  { %767 = vmatpush.msrb.mxu3 %v1920_v7 }
 0x530   :  { %768 = vmatpush.msrb.mxu3 %v1942_v13 }
 0x532   :  { %769 = vmatpush.msrb.mxu3 %v1948_v15 }
 0x534   :  { %770 = vmatpush.msrb.mxu3 %v1954_v16 }
 0x536   :  { %771 = vmatpush.msrb.mxu3 %v1962_v17 }
 0x538   :  { %772 = vmatpush.msrb.mxu3 %v1973_v19 }
 0x58a   :  { %v449_v33 = vpop.f32.mrf.mxu3 }
 0x58b   :  { %v452_v34 = vadd.f32 %v449_v33, %v188_v32 }
 0x58d   :  { %1529 = vtanh.f32 %v452_v34  ;;  %v1454_v39 = vmul.f32 -1.442695, %v452_v34 }
 0x593   :  { %v1530_v35 = vpop.eup %1529 }
 0x594   :  { %475 = vrot.lane.b32.xlu0 %v1530_v35, %s1711_s26  ;;  %v190_v35 = vpop.f32.mrf.mxu1 }
 0x5ac   :  { %v516_v36 = vpop.f32.mrf.mxu3 }
 0x5ad   :  { %v517_v37 = vadd.f32 %v2008_v18, %v516_v36  ;;  %v191_v36 = vadd.f32 %v1889_v40, %v190_v35 }
 0x5af   :  { %1531 = vtanh.f32 %v517_v37  ;;  %v1456_v46 = vmul.f32 -1.442695, %v517_v37 }
 0x5b0   :  { %1533 = vpow2.f32 %v1454_v39 }
 0x5b5   :  { %v1532_v38 = vpop.eup %1531 }
 0x5b6   :  { %541 = vrot.lane.b32.xlu1 %v1532_v38, %s1711_s26  ;;  %v1534_v41 = vpop.eup %1533 }
 0x5b7   :  { %v456_v42 = vadd.f32 1.0, %v1534_v41 }
 0x5b9   :  { %1535 = vrcp.f32 %v456_v42  ;;  %v468_v49 = vand.u32 2147483648, %v456_v42  ;;  %vm462_vm2 = vweird.f32 %v456_v42  ;;  %v466_v50 = vand.u32 2147483647, %v456_v42 }
 0x5ba   :  { %1537 = vpow2.f32 %v1456_v46 }
 0x5bb   :  { %v469_v52 = vor.u32 1.1754944e-38, %v468_v49  ;;  %vm467_vm4 = vcmp.eq.f32.partialorder %v466_v50, 8.507059e+37 }
 0x5bf   :  { %v1536_v43 = vpop.eup %1535 }
 0x5c0   :  { %v458_v44 = vmul.f32 %v1536_v43, %v456_v42  ;;  %vm463_vm15 = vweird.f32 %v1536_v43  ;;  %v1538_v53 = vpop.eup %1537 }
 0x5c1   :  { %vm464_vm3 = vmor %vm462_vm2, %vm463_vm15  ;;  %v522_v57 = vadd.f32 1.0, %v1538_v53 }
 0x5c2   :  { %v459_v45 = vsub.f32 1.0, %v458_v44 }
 0x5c3   :  { %1539 = vrcp.f32 %v522_v57  ;;  %v534_v63 = vand.u32 2147483648, %v522_v57  ;;  %vm528_vm7 = vweird.f32 %v522_v57  ;;  %v532_v0 = vand.u32 2147483647, %v522_v57 }
 0x5c4   :  { %v460_v47 = vmul.f32 %v1536_v43, %v459_v45 }
 0x5c5   :  { %v535_v3 = vor.u32 1.1754944e-38, %v534_v63  ;;  %vm533_vm9 = vcmp.eq.f32.partialorder %v532_v0, 8.507059e+37 }
 0x5c6   :  { %v461_v48 = vadd.f32 %v1536_v43, %v460_v47 }
 0x5c8   :  { %v465_v51 = vsel %vm464_vm3, %v1536_v43, %v461_v48 }
 0x5c9   :  { %v470_v55 = vsel %vm467_vm4, %v469_v52, %v465_v51  ;;  %v1540_v58 = vpop.eup %1539 }
 0x5ca   :  { %v524_v59 = vmul.f32 %v1540_v58, %v522_v57  ;;  %vm529_vm5 = vweird.f32 %v1540_v58  ;;  %v473_v21 = vmul.f32 %v470_v55, %v2020_v11 }
 0x5cb   :  { %vm530_vm8 = vmor %vm528_vm7, %vm529_vm5 }
 0x5cc   :  { %v525_v60 = vsub.f32 1.0, %v524_v59 }
 0x5ce   :  { %v526_v61 = vmul.f32 %v1540_v58, %v525_v60 }
 0x5d0   :  { %v527_v62 = vadd.f32 %v1540_v58, %v526_v61 }
 0x5d2   :  { %v531_v2 = vsel %vm530_vm8, %v1540_v58, %v527_v62 }
 0x5d3   :  { %v536_v12 = vsel %vm533_vm9, %v535_v3, %v531_v2 }
 0x5d4   :  { %v539_v1 = vmul.f32 %v536_v12, %v2024_v23 }
 0x606   :  { %v476_v54 = vpop.permute.xlu0 %475 }
 0x607   :  { %v478_v56 = vmul.f32 %v476_v54, %v470_v55 }
 0x609   :  { %480 = vrot.lane.b32.xlu2 %v478_v56, %s1712_s29 }
 0x628   :  { %v542_v9 = vpop.permute.xlu1 %541 }
 0x629   :  { %v544_v20 = vmul.f32 %v542_v9, %v536_v12 }
 0x62b   :  { %546 = vrot.lane.b32.xlu0 %v544_v20, %s1712_s29 }
 0x663   :  { %v481_v22 = vpop.permute.xlu2 %480 }
 0x664   :  { %v2055_v24 = vadd.f32 %v481_v22, %v473_v21 }
 0x666   :  { %1541 = vtanh.f32 %v2055_v24 }
 0x66c   :  { %v1542_v25 = vpop.eup %1541 }
 0x66d   :  { %486 = vrot.lane.b32.xlu1 %v1542_v25, %s1711_s26 }
 0x69d   :  { %v547_v26 = vpop.permute.xlu0 %546 }
 0x69e   :  { %v2060_v28 = vadd.f32 %v547_v26, %v539_v1 }
 0x6a0   :  { %1543 = vtanh.f32 %v2060_v28 }
 0x6a6   :  { %v1544_v29 = vpop.eup %1543 }
 0x6a7   :  { %552 = vrot.lane.b32.xlu2 %v1544_v29, %s1711_s26 }
 0x6df   :  { %v487_v30 = vpop.permute.xlu1 %486 }
 0x6e0   :  { %v489_v11 = vmul.f32 %v487_v30, %v470_v55 }
 0x6e2   :  { %557 = vrot.lane.b32.xlu0 %v489_v11, %s1712_s29 }
 0x701   :  { %v553_v31 = vpop.permute.xlu2 %552 }
 0x702   :  { %v2065_v32 = vmul.f32 %v553_v31, %v536_v12 }
 0x704   :  { %621 = vrot.lane.b32.xlu1 %v2065_v32, %s1711_s26 }
 0x754   :  { %v558_v33 = vpop.permute.xlu0 %557 }
 0x755   :  { %1457 = vmatmul.msk.f32.vlgmr.msrb.gmra.mxu2 %vm139_vm1, %v558_v33 }
 0x756   :  { %831 = vmatpush.msrb.mxu2 %v1812_v6 }
 0x758   :  { %832 = vmatpush.msrb.mxu2 %v1820_v8 }
 0x75a   :  { %833 = vmatpush.msrb.mxu2 %v1830_v10 }
 0x75c   :  { %834 = vmatpush.msrb.mxu2 %v1846_v14 }
 0x776   :  { %v622_v23 = vpop.permute.xlu1 %621 }
 0x777   :  { %v624_v34 = vsel %vm139_vm1, %v558_v33, %v622_v23 }
 0x778   :  { %1459 = vmatmul.msk.f32.vlgmr.msra.gmra.mxu2 %vm362_vm6, %v624_v34 }
 0x779   :  { %960 = vmatpush.msra.mxu2 %v1812_v6 }
 0x77b   :  { %961 = vmatpush.msra.mxu2 %v1820_v8 }
 0x77d   :  { %962 = vmatpush.msra.mxu2 %v1830_v10 }
 0x77f   :  { %963 = vmatpush.msra.mxu2 %v1846_v14 }
 0x7d8   :  { %v578_v37 = vpop.f32.mrf.mxu2 }
 0x7d9   :  { %v581_v38 = vadd.f32 %v578_v37, %v191_v36 }
 0x7db   :  { %1545 = vtanh.f32 %v581_v38  ;;  %v1458_v44 = vmul.f32 -1.442695, %v581_v38 }
 0x7e1   :  { %v1546_v39 = vpop.eup %1545 }
 0x7e2   :  { %604 = vrot.lane.b32.xlu2 %v1546_v39, %s1711_s26 }
 0x7fb   :  { %v645_v41 = vpop.f32.mrf.mxu2 }
 0x7fc   :  { %v646_v42 = vadd.f32 %v2008_v18, %v645_v41 }
 0x7fe   :  { %1547 = vtanh.f32 %v646_v42  ;;  %v1460_v59 = vmul.f32 -1.442695, %v646_v42 }
 0x7ff   :  { %1549 = vpow2.f32 %v1458_v44 }
 0x804   :  { %v1548_v43 = vpop.eup %1547 }
 0x805   :  { %670 = vrot.lane.b32.xlu0 %v1548_v43, %s1711_s26  ;;  %v1550_v45 = vpop.eup %1549 }
 0x806   :  { %v585_v46 = vadd.f32 1.0, %v1550_v45 }
 0x808   :  { %1551 = vrcp.f32 %v585_v46  ;;  %v597_v52 = vand.u32 2147483648, %v585_v46  ;;  %vm591_vm11 = vweird.f32 %v585_v46  ;;  %v595_v53 = vand.u32 2147483647, %v585_v46 }
 0x809   :  { %1553 = vpow2.f32 %v1460_v59 }
 0x80a   :  { %v598_v55 = vor.u32 1.1754944e-38, %v597_v52  ;;  %vm596_vm13 = vcmp.eq.f32.partialorder %v595_v53, 8.507059e+37 }
 0x80e   :  { %v1552_v47 = vpop.eup %1551 }
 0x80f   :  { %v587_v48 = vmul.f32 %v1552_v47, %v585_v46  ;;  %vm592_vm10 = vweird.f32 %v1552_v47  ;;  %v1554_v60 = vpop.eup %1553 }
 0x810   :  { %vm593_vm12 = vmor %vm591_vm11, %vm592_vm10  ;;  %v651_v61 = vadd.f32 1.0, %v1554_v60 }
 0x811   :  { %v588_v49 = vsub.f32 1.0, %v587_v48 }
 0x812   :  { %1555 = vrcp.f32 %v651_v61  ;;  %v663_v9 = vand.u32 2147483648, %v651_v61  ;;  %vm657_vm15 = vweird.f32 %v651_v61  ;;  %v661_v12 = vand.u32 2147483647, %v651_v61 }
 0x813   :  { %v589_v50 = vmul.f32 %v1552_v47, %v588_v49 }
 0x814   :  { %v664_v21 = vor.u32 1.1754944e-38, %v663_v9  ;;  %vm662_vm3 = vcmp.eq.f32.partialorder %v661_v12, 8.507059e+37 }
 0x815   :  { %v590_v51 = vadd.f32 %v1552_v47, %v589_v50 }
 0x817   :  { %v594_v54 = vsel %vm593_vm12, %v1552_v47, %v590_v51 }
 0x818   :  { %v599_v56 = vsel %vm596_vm13, %v598_v55, %v594_v54  ;;  %v1556_v62 = vpop.eup %1555 }
 0x819   :  { %v653_v63 = vmul.f32 %v1556_v62, %v651_v61  ;;  %vm658_vm14 = vweird.f32 %v1556_v62  ;;  %v602_v26 = vmul.f32 %v599_v56, %v2055_v24 }
 0x81a   :  { %vm659_vm2 = vmor %vm657_vm15, %vm658_vm14 }
 0x81b   :  { %v654_v0 = vsub.f32 1.0, %v653_v63 }
 0x81d   :  { %v655_v2 = vmul.f32 %v1556_v62, %v654_v0 }
 0x81f   :  { %v656_v3 = vadd.f32 %v1556_v62, %v655_v2 }
 0x821   :  { %v660_v20 = vsel %vm659_vm2, %v1556_v62, %v656_v3 }
 0x822   :  { %v665_v25 = vsel %vm662_vm3, %v664_v21, %v660_v20 }
 0x823   :  { %v668_v31 = vmul.f32 %v665_v25, %v2060_v28 }
 0x83c   :  { %v605_v57 = vpop.permute.xlu2 %604 }
 0x83d   :  { %v607_v58 = vmul.f32 %v605_v57, %v599_v56 }
 0x83f   :  { %609 = vrot.lane.b32.xlu1 %v607_v58, %s1712_s29 }
 0x877   :  { %v671_v22 = vpop.permute.xlu0 %670 }
 0x878   :  { %v673_v1 = vmul.f32 %v671_v22, %v665_v25 }
 0x87a   :  { %675 = vrot.lane.b32.xlu2 %v673_v1, %s1712_s29 }
 0x8b1   :  { %v610_v29 = vpop.permute.xlu1 %609 }
 0x8b2   :  { %v2087_v30 = vadd.f32 %v610_v29, %v602_v26 }
 0x8b4   :  { %1557 = vtanh.f32 %v2087_v30 }
 0x8ba   :  { %v1558_v11 = vpop.eup %1557 }
 0x8bb   :  { %615 = vrot.lane.b32.xlu0 %v1558_v11, %s1711_s26 }
 0x8d4   :  { %v676_v33 = vpop.permute.xlu2 %675 }
 0x8d5   :  { %v2092_v23 = vadd.f32 %v676_v33, %v668_v31 }
 0x8d7   :  { %1559 = vtanh.f32 %v2092_v23 }
 0x8dd   :  { %v1560_v34 = vpop.eup %1559 }
 0x8de   :  { %681 = vrot.lane.b32.xlu1 %v1560_v34, %s1711_s26 }
 0x92d   :  { %v616_v35 = vpop.permute.xlu0 %615 }
 0x92e   :  { %v618_v24 = vmul.f32 %v616_v35, %v599_v56 }
 0x930   :  { %686 = vrot.lane.b32.xlu2 %v618_v24, %s1712_s29 }
 0x950   :  { %v682_v36 = vpop.permute.xlu1 %681 }
 0x951   :  { %v2097_v37 = vmul.f32 %v682_v36, %v665_v25 }
 0x953   :  { %750 = vrot.lane.b32.xlu0 %v2097_v37, %s1711_s26 }
 0x98a   :  { %v687_v38 = vpop.permute.xlu2 %686 }
 0x98b   :  { %1461 = vmatmul.msk.f32.vlgmr.msra.gmra.mxu3 %vm139_vm1, %v687_v38 }
 0x98c   :  { %1089 = vmatpush.msra.mxu3 %v1812_v6  ;;  %v193_v6 = vpop.f32.mrf.mxu1 }
 0x98e   :  { %1090 = vmatpush.msra.mxu3 %v1820_v8  ;;  %v194_v8 = vadd.f32 %v1889_v40, %v193_v6 }
 0x990   :  { %1091 = vmatpush.msra.mxu3 %v1830_v10 }
 0x992   :  { %1092 = vmatpush.msra.mxu3 %v1846_v14 }
 0x9c5   :  { %v751_v28 = vpop.permute.xlu0 %750 }
 0x9c6   :  { %v753_v39 = vsel %vm139_vm1, %v687_v38, %v751_v28 }
 0x9c7   :  { %1463 = vmatmul.msk.f32.vlgmr.msrb.gmra.mxu3 %vm362_vm6, %v753_v39 }
 0x9c8   :  { %1221 = vmatpush.msrb.mxu3 %v1908_v4 }
 0x9ca   :  { %1222 = vmatpush.msrb.mxu3 %v1913_v5 }
 0x9cc   :  { %1223 = vmatpush.msrb.mxu3 %v1920_v7 }
 0x9ce   :  { %1224 = vmatpush.msrb.mxu3 %v1942_v13 }
 0x9d0   :  { %1225 = vmatpush.msrb.mxu3 %v1948_v15 }
 0x9d2   :  { %1226 = vmatpush.msrb.mxu3 %v1954_v16 }
 0x9d4   :  { %1227 = vmatpush.msrb.mxu3 %v1962_v17 }
 0x9d6   :  { %1228 = vmatpush.msrb.mxu3 %v1973_v19 }
 0xa0e   :  { %v707_v10 = vpop.f32.mrf.mxu3 }
 0xa0f   :  { %v710_v14 = vadd.f32 %v707_v10, %v194_v8 }
 0xa11   :  { %1561 = vtanh.f32 %v710_v14  ;;  %v1462_v45 = vmul.f32 -1.442695, %v710_v14 }
 0xa17   :  { %v1562_v41 = vpop.eup %1561 }
 0xa18   :  { %733 = vrot.lane.b32.xlu1 %v1562_v41, %s1711_s26 }
 0xa4a   :  { %v774_v42 = vpop.f32.mrf.mxu3 }
 0xa4b   :  { %v775_v43 = vadd.f32 %v2008_v18, %v774_v42 }
 0xa4d   :  { %1563 = vtanh.f32 %v775_v43  ;;  %v1464_v52 = vmul.f32 -1.442695, %v775_v43 }
 0xa4e   :  { %1565 = vpow2.f32 %v1462_v45 }
 0xa53   :  { %v1564_v44 = vpop.eup %1563 }
 0xa54   :  { %799 = vrot.lane.b32.xlu2 %v1564_v44, %s1711_s26  ;;  %v1566_v46 = vpop.eup %1565 }
 0xa55   :  { %v714_v47 = vadd.f32 1.0, %v1566_v46 }
 0xa57   :  { %1567 = vrcp.f32 %v714_v47  ;;  %v726_v54 = vand.u32 2147483648, %v714_v47  ;;  %vm720_vm5 = vweird.f32 %v714_v47  ;;  %v724_v55 = vand.u32 2147483647, %v714_v47 }
 0xa58   :  { %1569 = vpow2.f32 %v1464_v52 }
 0xa59   :  { %v727_v57 = vor.u32 1.1754944e-38, %v726_v54  ;;  %vm725_vm8 = vcmp.eq.f32.partialorder %v724_v55, 8.507059e+37 }
 0xa5d   :  { %v1568_v48 = vpop.eup %1567 }
 0xa5e   :  { %v716_v49 = vmul.f32 %v1568_v48, %v714_v47  ;;  %vm721_vm4 = vweird.f32 %v1568_v48  ;;  %v1570_v60 = vpop.eup %1569 }
 0xa5f   :  { %vm722_vm7 = vmor %vm720_vm5, %vm721_vm4  ;;  %v780_v62 = vadd.f32 1.0, %v1570_v60 }
 0xa60   :  { %v717_v50 = vsub.f32 1.0, %v716_v49 }
 0xa61   :  { %1571 = vrcp.f32 %v780_v62  ;;  %v792_v12 = vand.u32 2147483648, %v780_v62  ;;  %vm786_vm10 = vweird.f32 %v780_v62  ;;  %v790_v20 = vand.u32 2147483647, %v780_v62 }
 0xa62   :  { %v718_v51 = vmul.f32 %v1568_v48, %v717_v50 }
 0xa63   :  { %v793_v22 = vor.u32 1.1754944e-38, %v792_v12  ;;  %vm791_vm12 = vcmp.eq.f32.partialorder %v790_v20, 8.507059e+37 }
 0xa64   :  { %v719_v53 = vadd.f32 %v1568_v48, %v718_v51 }
 0xa66   :  { %v723_v56 = vsel %vm722_vm7, %v1568_v48, %v719_v53 }
 0xa67   :  { %v728_v59 = vsel %vm725_vm8, %v727_v57, %v723_v56  ;;  %v1572_v63 = vpop.eup %1571 }
 0xa68   :  { %v782_v0 = vmul.f32 %v1572_v63, %v780_v62  ;;  %vm787_vm9 = vweird.f32 %v1572_v63  ;;  %v731_v29 = vmul.f32 %v728_v59, %v2087_v30 }
 0xa69   :  { %vm788_vm11 = vmor %vm786_vm10, %vm787_vm9 }
 0xa6a   :  { %v783_v2 = vsub.f32 1.0, %v782_v0 }
 0xa6c   :  { %v784_v3 = vmul.f32 %v1572_v63, %v783_v2 }
 0xa6e   :  { %v785_v9 = vadd.f32 %v1572_v63, %v784_v3 }
 0xa70   :  { %v789_v21 = vsel %vm788_vm11, %v1572_v63, %v785_v9 }
 0xa71   :  { %v794_v1 = vsel %vm791_vm12, %v793_v22, %v789_v21 }
 0xa72   :  { %v797_v34 = vmul.f32 %v794_v1, %v2092_v23 }
 0xa8a   :  { %v734_v58 = vpop.permute.xlu1 %733 }
 0xa8b   :  { %v736_v61 = vmul.f32 %v734_v58, %v728_v59 }
 0xa8d   :  { %738 = vrot.lane.b32.xlu0 %v736_v61, %s1712_s29 }
 0xaae   :  { %v800_v25 = vpop.permute.xlu2 %799 }
 0xaaf   :  { %v802_v26 = vmul.f32 %v800_v25, %v794_v1 }
 0xab1   :  { %804 = vrot.lane.b32.xlu1 %v802_v26, %s1712_s29 }
 0xaff   :  { %v739_v11 = vpop.permute.xlu0 %738 }
 0xb00   :  { %v2123_v31 = vadd.f32 %v739_v11, %v731_v29 }
 0xb02   :  { %1573 = vtanh.f32 %v2123_v31 }
 0xb08   :  { %v1574_v33 = vpop.eup %1573 }
 0xb09   :  { %744 = vrot.lane.b32.xlu2 %v1574_v33, %s1711_s26 }
 0xb23   :  { %v805_v35 = vpop.permute.xlu1 %804 }
 0xb24   :  { %v2128_v24 = vadd.f32 %v805_v35, %v797_v34 }
 0xb26   :  { %1575 = vtanh.f32 %v2128_v24 }
 0xb2c   :  { %v1576_v36 = vpop.eup %1575 }
 0xb2d   :  { %810 = vrot.lane.b32.xlu0 %v1576_v36, %s1711_s26 }
 0xb63   :  { %v745_v38 = vpop.permute.xlu2 %744 }
 0xb64   :  { %v747_v30 = vmul.f32 %v745_v38, %v728_v59 }
 0xb66   :  { %815 = vrot.lane.b32.xlu1 %v747_v30, %s1712_s29  ;;  %v2175_v30 = vld [vmem:[%s2312_s8] ss:$0 sm:$0xff] }
 0xb9f   :  { %v811_v28 = vpop.permute.xlu0 %810 }
 0xba0   :  { %v2133_v39 = vmul.f32 %v811_v28, %v794_v1 }
 0xba2   :  { %879 = vrot.lane.b32.xlu2 %v2133_v39, %s1711_s26 }
 0xbd8   :  { %v816_v6 = vpop.permute.xlu1 %815 }
 0xbd9   :  { %1465 = vmatmul.msk.f32.vlgmr.msrb.gmra.mxu2 %vm139_vm1, %v816_v6 }
 0xbda   :  { %1152 = vmatpush.msrb.mxu2 %v1908_v4  ;;  %v196_v4 = vpop.f32.mrf.mxu1 }
 0xbdc   :  { %1153 = vmatpush.msrb.mxu2 %v1913_v5  ;;  %v197_v5 = vadd.f32 %v1889_v40, %v196_v4 }
 0xbde   :  { %1154 = vmatpush.msrb.mxu2 %v1920_v7 }
 0xbe0   :  { %1155 = vmatpush.msrb.mxu2 %v1942_v13 }
 0xbe2   :  { %1156 = vmatpush.msrb.mxu2 %v1948_v15  ;;  %v199_v38 = vpop.f32.mrf.mxu1 }
 0xbe3   :  { %v200_v28 = vadd.f32 %v2175_v30, %v199_v38 }
 0xbe4   :  { %1157 = vmatpush.msrb.mxu2 %v1954_v16 }
 0xbe6   :  { %1158 = vmatpush.msrb.mxu2 %v1962_v17 }
 0xbe8   :  { %1159 = vmatpush.msrb.mxu2 %v1973_v19 }
 0xbea   :  { %v2179_v4 = vpop.f32.mrf.mxu1 }
 0xbfc   :  { %v880_v23 = vpop.permute.xlu2 %879 }
 0xbfd   :  { %v882_v8 = vsel %vm139_vm1, %v816_v6, %v880_v23 }
 0xbfe   :  { %1467 = vmatmul.msk.f32.vlgmr.msrb.gmra.mxu0 %vm362_vm6, %v882_v8 }
 0xc5c   :  { %v836_v10 = vpop.f32.mrf.mxu2 }
 0xc5d   :  { %v839_v7 = vadd.f32 %v836_v10, %v197_v5 }
 0xc5f   :  { %1577 = vtanh.f32 %v839_v7  ;;  %v1466_v19 = vmul.f32 -1.442695, %v839_v7 }
 0xc65   :  { %v1578_v13 = vpop.eup %1577 }
 0xc66   :  { %862 = vrot.lane.b32.xlu0 %v1578_v13, %s1711_s26 }
 0xc7b   :  { %v903_v15 = vpop.f32.mrf.mxu0 }
 0xc7c   :  { %v904_v16 = vadd.f32 %v2008_v18, %v903_v15 }
 0xc7e   :  { %1579 = vtanh.f32 %v904_v16  ;;  %v1468_v44 = vmul.f32 -1.442695, %v904_v16 }
 0xc7f   :  { %1581 = vpow2.f32 %v1466_v19 }
 0xc84   :  { %v1580_v17 = vpop.eup %1579 }
 0xc85   :  { %928 = vrot.lane.b32.xlu1 %v1580_v17, %s1711_s26  ;;  %v1582_v14 = vpop.eup %1581 }
 0xc86   :  { %v843_v41 = vadd.f32 1.0, %v1582_v14 }
 0xc88   :  { %1583 = vrcp.f32 %v843_v41  ;;  %v855_v47 = vand.u32 2147483648, %v843_v41  ;;  %vm849_vm14 = vweird.f32 %v843_v41  ;;  %v853_v48 = vand.u32 2147483647, %v843_v41 }
 0xc89   :  { %1585 = vpow2.f32 %v1468_v44 }
 0xc8a   :  { %v856_v51 = vor.u32 1.1754944e-38, %v855_v47  ;;  %vm854_vm2 = vcmp.eq.f32.partialorder %v853_v48, 8.507059e+37 }
 0xc8e   :  { %v1584_v42 = vpop.eup %1583 }
 0xc8f   :  { %v845_v40 = vmul.f32 %v1584_v42, %v843_v41  ;;  %vm850_vm13 = vweird.f32 %v1584_v42  ;;  %v1586_v49 = vpop.eup %1585 }
 0xc90   :  { %vm851_vm15 = vmor %vm849_vm14, %vm850_vm13  ;;  %v909_v52 = vadd.f32 1.0, %v1586_v49 }
 0xc91   :  { %v846_v43 = vsub.f32 1.0, %v845_v40 }
 0xc92   :  { %1587 = vrcp.f32 %v909_v52  ;;  %v921_v61 = vand.u32 2147483648, %v909_v52  ;;  %vm915_vm4 = vweird.f32 %v909_v52  ;;  %v919_v62 = vand.u32 2147483647, %v909_v52 }
 0xc93   :  { %v847_v45 = vmul.f32 %v1584_v42, %v846_v43 }
 0xc94   :  { %v922_v0 = vor.u32 1.1754944e-38, %v921_v61  ;;  %vm920_vm7 = vcmp.eq.f32.partialorder %v919_v62, 8.507059e+37 }
 0xc95   :  { %v848_v46 = vadd.f32 %v1584_v42, %v847_v45 }
 0xc97   :  { %v852_v50 = vsel %vm851_vm15, %v1584_v42, %v848_v46 }
 0xc98   :  { %v857_v53 = vsel %vm854_vm2, %v856_v51, %v852_v50  ;;  %v1588_v56 = vpop.eup %1587 }
 0xc99   :  { %v911_v57 = vmul.f32 %v1588_v56, %v909_v52  ;;  %vm916_vm3 = vweird.f32 %v1588_v56  ;;  %v860_v12 = vmul.f32 %v857_v53, %v2123_v31 }
 0xc9a   :  { %vm917_vm5 = vmor %vm915_vm4, %vm916_vm3 }
 0xc9b   :  { %v912_v58 = vsub.f32 1.0, %v911_v57 }
 0xc9d   :  { %v913_v59 = vmul.f32 %v1588_v56, %v912_v58 }
 0xc9f   :  { %v914_v60 = vadd.f32 %v1588_v56, %v913_v59 }
 0xca1   :  { %v918_v63 = vsel %vm917_vm5, %v1588_v56, %v914_v60 }
 0xca2   :  { %v923_v3 = vsel %vm920_vm7, %v922_v0, %v918_v63 }
 0xca3   :  { %v926_v25 = vmul.f32 %v923_v3, %v2128_v24 }
 0xcd8   :  { %v863_v54 = vpop.permute.xlu0 %862 }
 0xcd9   :  { %v865_v55 = vmul.f32 %v863_v54, %v857_v53 }
 0xcdb   :  { %867 = vrot.lane.b32.xlu2 %v865_v55, %s1712_s29 }
 0xcf7   :  { %v929_v2 = vpop.permute.xlu1 %928 }
 0xcf8   :  { %v931_v9 = vmul.f32 %v929_v2, %v923_v3 }
 0xcfa   :  { %933 = vrot.lane.b32.xlu0 %v931_v9, %s1712_s29 }
 0xd35   :  { %v868_v20 = vpop.permute.xlu2 %867 }
 0xd36   :  { %v2155_v21 = vadd.f32 %v868_v20, %v860_v12 }
 0xd38   :  { %1589 = vtanh.f32 %v2155_v21 }
 0xd3e   :  { %v1590_v22 = vpop.eup %1589 }
 0xd3f   :  { %873 = vrot.lane.b32.xlu1 %v1590_v22, %s1711_s26 }
 0xd6c   :  { %v934_v1 = vpop.permute.xlu0 %933 }
 0xd6d   :  { %v2160_v26 = vadd.f32 %v934_v1, %v926_v25 }
 0xd6f   :  { %1591 = vtanh.f32 %v2160_v26 }
 0xd75   :  { %v1592_v29 = vpop.eup %1591 }
 0xd76   :  { %939 = vrot.lane.b32.xlu2 %v1592_v29, %s1711_s26 }
 0xdb1   :  { %v874_v11 = vpop.permute.xlu1 %873 }
 0xdb2   :  { %v876_v31 = vmul.f32 %v874_v11, %v857_v53 }
 0xdb4   :  { %944 = vrot.lane.b32.xlu0 %v876_v31, %s1712_s29 }
 0xdd0   :  { %v940_v33 = vpop.permute.xlu2 %939 }
 0xdd1   :  { %v2165_v34 = vmul.f32 %v940_v33, %v923_v3  ;;  %v203_v33 = vadd.f32 %v2175_v30, %v2179_v4 }
 0xdd3   :  { %1008 = vrot.lane.b32.xlu1 %v2165_v34, %s1711_s26 }
 0xe26   :  { %v945_v35 = vpop.permute.xlu0 %944 }
 0xe27   :  { %1469 = vmatmul.msk.f32.vlgmr.msra.gmra.mxu2 %vm139_vm1, %v945_v35 }
 0xe45   :  { %v1009_v24 = vpop.permute.xlu1 %1008 }
 0xe46   :  { %v1011_v36 = vsel %vm139_vm1, %v945_v35, %v1009_v24 }
 0xe47   :  { %1471 = vmatmul.msk.f32.vlgmr.msra.gmra.mxu1 %vm362_vm6, %v1011_v36 }
 0xeaa   :  { %v965_v6 = vpop.f32.mrf.mxu2 }
 0xeab   :  { %v968_v23 = vadd.f32 %v965_v6, %v200_v28  ;;  %v2209_v28 = vld [vmem:[%s2312_s8 + $0x1] ss:$0 sm:$0xff]  ;;  %s1713_s8 = smov 96  }
 0xead   :  { %1593 = vtanh.f32 %v968_v23  ;;  %v1470_v13 = vmul.f32 -1.442695, %v968_v23 }
 0xeb3   :  { %v1594_v8 = vpop.eup %1593 }
 0xeb4   :  { %991 = vrot.lane.b32.xlu2 %v1594_v8, %s1711_s26 }
 0xec4   :  { %v1032_v5 = vpop.f32.mrf.mxu1 }
 0xec5   :  { %v1033_v10 = vadd.f32 %v2008_v18, %v1032_v5 }
 0xec7   :  { %1595 = vtanh.f32 %v1033_v10  ;;  %v1472_v48 = vmul.f32 -1.442695, %v1033_v10 }
 0xec8   :  { %1597 = vpow2.f32 %v1470_v13 }
 0xecd   :  { %v1596_v7 = vpop.eup %1595 }
 0xece   :  { %1057 = vrot.lane.b32.xlu0 %v1596_v7, %s1711_s26  ;;  %v1598_v15 = vpop.eup %1597 }
 0xecf   :  { %v972_v16 = vadd.f32 1.0, %v1598_v15 }
 0xed1   :  { %1599 = vrcp.f32 %v972_v16  ;;  %v984_v40 = vand.u32 2147483648, %v972_v16  ;;  %vm978_vm9 = vweird.f32 %v972_v16  ;;  %v982_v43 = vand.u32 2147483647, %v972_v16 }
 0xed2   :  { %1601 = vpow2.f32 %v1472_v48 }
 0xed3   :  { %v985_v44 = vor.u32 1.1754944e-38, %v984_v40  ;;  %vm983_vm11 = vcmp.eq.f32.partialorder %v982_v43, 8.507059e+37 }
 0xed7   :  { %v1600_v17 = vpop.eup %1599 }
 0xed8   :  { %v974_v19 = vmul.f32 %v1600_v17, %v972_v16  ;;  %vm979_vm8 = vweird.f32 %v1600_v17  ;;  %v1602_v49 = vpop.eup %1601 }
 0xed9   :  { %vm980_vm10 = vmor %vm978_vm9, %vm979_vm8  ;;  %v1038_v50 = vadd.f32 1.0, %v1602_v49 }
 0xeda   :  { %v975_v14 = vsub.f32 1.0, %v974_v19 }
 0xedb   :  { %1603 = vrcp.f32 %v1038_v50  ;;  %v1050_v56 = vand.u32 2147483648, %v1038_v50  ;;  %vm1044_vm13 = vweird.f32 %v1038_v50  ;;  %v1048_v57 = vand.u32 2147483647, %v1038_v50 }
 0xedc   :  { %v976_v41 = vmul.f32 %v1600_v17, %v975_v14 }
 0xedd   :  { %v1051_v59 = vor.u32 1.1754944e-38, %v1050_v56  ;;  %vm1049_vm15 = vcmp.eq.f32.partialorder %v1048_v57, 8.507059e+37 }
 0xede   :  { %v977_v42 = vadd.f32 %v1600_v17, %v976_v41 }
 0xee0   :  { %v981_v18 = vsel %vm980_vm10, %v1600_v17, %v977_v42 }
 0xee1   :  { %v986_v46 = vsel %vm983_vm11, %v985_v44, %v981_v18  ;;  %v1604_v51 = vpop.eup %1603 }
 0xee2   :  { %v1040_v52 = vmul.f32 %v1604_v51, %v1038_v50  ;;  %vm1045_vm12 = vweird.f32 %v1604_v51  ;;  %v989_v63 = vmul.f32 %v986_v46, %v2155_v21 }
 0xee3   :  { %vm1046_vm14 = vmor %vm1044_vm13, %vm1045_vm12 }
 0xee4   :  { %v1041_v53 = vsub.f32 1.0, %v1040_v52 }
 0xee6   :  { %v1042_v54 = vmul.f32 %v1604_v51, %v1041_v53 }
 0xee8   :  { %v1043_v55 = vadd.f32 %v1604_v51, %v1042_v54 }
 0xeea   :  { %v1047_v58 = vsel %vm1046_vm14, %v1604_v51, %v1043_v55 }
 0xeeb   :  { %v1052_v61 = vsel %vm1049_vm15, %v1051_v59, %v1047_v58 }
 0xeec   :  { %v1055_v9 = vmul.f32 %v1052_v61, %v2160_v26 }
 0xf0e   :  { %v992_v45 = vpop.permute.xlu2 %991 }
 0xf0f   :  { %v994_v47 = vmul.f32 %v992_v45, %v986_v46 }
 0xf11   :  { %996 = vrot.lane.b32.xlu1 %v994_v47, %s1712_s29 }
 0xf40   :  { %v1058_v60 = vpop.permute.xlu0 %1057 }
 0xf41   :  { %v1060_v62 = vmul.f32 %v1058_v60, %v1052_v61 }
 0xf43   :  { %1062 = vrot.lane.b32.xlu2 %v1060_v62, %s1712_s29 }
 0xf83   :  { %v997_v0 = vpop.permute.xlu1 %996 }
 0xf84   :  { %v2186_v2 = vadd.f32 %v997_v0, %v989_v63 }
 0xf86   :  { %1605 = vtanh.f32 %v2186_v2 }
 0xf8c   :  { %v1606_v3 = vpop.eup %1605 }
 0xf8d   :  { %1002 = vrot.lane.b32.xlu0 %v1606_v3, %s1711_s26 }
 0xf9d   :  { %v1063_v12 = vpop.permute.xlu2 %1062 }
 0xf9e   :  { %v2191_v20 = vadd.f32 %v1063_v12, %v1055_v9 }
 0xfa0   :  { %1607 = vtanh.f32 %v2191_v20 }
 0xfa6   :  { %v1608_v22 = vpop.eup %1607 }
 0xfa7   :  { %1068 = vrot.lane.b32.xlu1 %v1608_v22, %s1711_s26  ;;  %v1290_v22 = vld [vmem:[%s2313_s9 + $0x10] sm:$0xff] }
 0xfff   :  { %v1003_v25 = vpop.permute.xlu0 %1002 }
0x1000   :  { %v1005_v21 = vmul.f32 %v1003_v25, %v986_v46  ;;  %v1288_v25 = vld [vmem:[%s2313_s9] sm:$0xff] }
0x1002   :  { %1073 = vrot.lane.b32.xlu2 %v1005_v21, %s1712_s29 }
0x1019   :  { %v1069_v1 = vpop.permute.xlu1 %1068 }
0x101a   :  { %v2196_v29 = vmul.f32 %v1069_v1, %v1052_v61 }
0x101c   :  { %1137 = vrot.lane.b32.xlu0 %v2196_v29, %s1711_s26 }
0x105c   :  { %v1074_v11 = vpop.permute.xlu2 %1073 }
0x105d   :  { %1473 = vmatmul.msk.f32.vlgmr.msra.gmra.mxu3 %vm139_vm1, %v1074_v11 }
0x108e   :  { %v1138_v26 = vpop.permute.xlu0 %1137 }
0x108f   :  { %v1140_v31 = vsel %vm139_vm1, %v1074_v11, %v1138_v26 }
0x1090   :  { %1475 = vmatmul.msk.f32.vlgmr.msrb.gmra.mxu2 %vm362_vm6, %v1140_v31 }
0x10e0   :  { %v1094_v35 = vpop.f32.mrf.mxu3 }
0x10e1   :  { %v1097_v24 = vadd.f32 %v1094_v35, %v203_v33  ;;  %v2253_v33 = vld [vmem:[%s2314_s10] ss:$0 sm:$0xff] }
0x10e3   :  { %1609 = vtanh.f32 %v1097_v24  ;;  %v1474_v8 = vmul.f32 -1.442695, %v1097_v24 }
0x10e9   :  { %v1610_v36 = vpop.eup %1609 }
0x10ea   :  { %1120 = vrot.lane.b32.xlu1 %v1610_v36, %s1711_s26 }
0x1113   :  { %v1161_v38 = vpop.f32.mrf.mxu2 }
0x1114   :  { %v1162_v6 = vadd.f32 %v2209_v28, %v1161_v38 }
0x1116   :  { %1611 = vtanh.f32 %v1162_v6  ;;  %v1476_v7 = vmul.f32 -1.442695, %v1162_v6 }
0x1117   :  { %1613 = vpow2.f32 %v1474_v8 }
0x111c   :  { %v1612_v23 = vpop.eup %1611 }
0x111d   :  { %1186 = vrot.lane.b32.xlu2 %v1612_v23, %s1711_s26  ;;  %v1614_v30 = vpop.eup %1613 }
0x111e   :  { %v1101_v4 = vadd.f32 1.0, %v1614_v30 }
0x1120   :  { %1615 = vrcp.f32 %v1101_v4  ;;  %v1113_v19 = vand.u32 2147483648, %v1101_v4  ;;  %vm1107_vm3 = vweird.f32 %v1101_v4  ;;  %v1111_v41 = vand.u32 2147483647, %v1101_v4 }
0x1121   :  { %1617 = vpow2.f32 %v1476_v7 }
0x1122   :  { %v1114_v40 = vor.u32 1.1754944e-38, %v1113_v19  ;;  %vm1112_vm5 = vcmp.eq.f32.partialorder %v1111_v41, 8.507059e+37 }
0x1126   :  { %v1616_v5 = vpop.eup %1615 }
0x1127   :  { %v1103_v10 = vmul.f32 %v1616_v5, %v1101_v4  ;;  %v1618_v16 = vpop.eup %1617  ;;  %vm1108_vm2 = vweird.f32 %v1616_v5 }
0x1128   :  { %v1167_v14 = vadd.f32 1.0, %v1618_v16  ;;  %vm1109_vm4 = vmor %vm1107_vm3, %vm1108_vm2 }
0x1129   :  { %v1104_v13 = vsub.f32 1.0, %v1103_v10 }
0x112a   :  { %1619 = vrcp.f32 %v1167_v14  ;;  %v1179_v50 = vand.u32 2147483648, %v1167_v14  ;;  %vm1173_vm8 = vweird.f32 %v1167_v14  ;;  %v1177_v51 = vand.u32 2147483647, %v1167_v14 }
0x112b   :  { %v1105_v15 = vmul.f32 %v1616_v5, %v1104_v13 }
0x112c   :  { %v1180_v53 = vor.u32 1.1754944e-38, %v1179_v50  ;;  %vm1178_vm10 = vcmp.eq.f32.partialorder %v1177_v51, 8.507059e+37 }
0x112d   :  { %v1106_v17 = vadd.f32 %v1616_v5, %v1105_v15 }
0x112f   :  { %v1110_v42 = vsel %vm1109_vm4, %v1616_v5, %v1106_v17 }
0x1130   :  { %v1115_v43 = vsel %vm1112_vm5, %v1114_v40, %v1110_v42  ;;  %v1620_v45 = vpop.eup %1619 }
0x1131   :  { %v1169_v46 = vmul.f32 %v1620_v45, %v1167_v14  ;;  %vm1174_vm7 = vweird.f32 %v1620_v45  ;;  %v1118_v57 = vmul.f32 %v1115_v43, %v2186_v2 }
0x1132   :  { %vm1175_vm9 = vmor %vm1173_vm8, %vm1174_vm7 }
0x1133   :  { %v1170_v47 = vsub.f32 1.0, %v1169_v46 }
0x1135   :  { %v1171_v48 = vmul.f32 %v1620_v45, %v1170_v47 }
0x1137   :  { %v1172_v49 = vadd.f32 %v1620_v45, %v1171_v48 }
0x1139   :  { %v1176_v52 = vsel %vm1175_vm9, %v1620_v45, %v1172_v49 }
0x113a   :  { %v1181_v55 = vsel %vm1178_vm10, %v1180_v53, %v1176_v52 }
0x113b   :  { %v1184_v61 = vmul.f32 %v1181_v55, %v2191_v20  ;;  %v1291_v20 = vld [vmem:[%s2313_s9 + $0x18] sm:$0xff] }
0x113c   :  { %1338 = vmatpush.msra.mxu0 %v1291_v20 }
0x113e   :  { %1339 = vmatpush.msra.mxu0 %v1290_v22 }
0x115c   :  { %v1121_v18 = vpop.permute.xlu1 %1120 }
0x115d   :  { %v1123_v44 = vmul.f32 %v1121_v18, %v1115_v43 }
0x115f   :  { %1125 = vrot.lane.b32.xlu0 %v1123_v44, %s1712_s29 }
0x1177   :  { %v1187_v54 = vpop.permute.xlu2 %1186 }
0x1178   :  { %v1189_v56 = vmul.f32 %v1187_v54, %v1181_v55 }
0x117a   :  { %1191 = vrot.lane.b32.xlu1 %v1189_v56, %s1712_s29 }
0x11d1   :  { %v1126_v58 = vpop.permute.xlu0 %1125 }
0x11d2   :  { %v1128_v59 = vadd.f32 %v1126_v58, %v1118_v57 }
0x11d4   :  { %1621 = vtanh.f32 %v1128_v59 }
0x11da   :  { %v1622_v60 = vpop.eup %1621 }
0x11db   :  { %1131 = vrot.lane.b32.xlu2 %v1622_v60, %s1711_s26 }
0x11ec   :  { %v1192_v62 = vpop.permute.xlu1 %1191 }
0x11ed   :  { %v2218_v63 = vadd.f32 %v1192_v62, %v1184_v61 }
0x11ef   :  { %1623 = vtanh.f32 %v2218_v63 }
0x11f5   :  { %v1624_v0 = vpop.eup %1623 }
0x11f6   :  { %1197 = vrot.lane.b32.xlu0 %v1624_v0, %s1711_s26 }
0x1235   :  { %v1132_v3 = vpop.permute.xlu2 %1131 }
0x1236   :  { %v1134_v9 = vmul.f32 %v1132_v3, %v1115_v43 }
0x1238   :  { %1202 = vrot.lane.b32.xlu1 %v1134_v9, %s1712_s29 }
0x1268   :  { %v1198_v2 = vpop.permute.xlu0 %1197 }
0x1269   :  { %v1200_v12 = vmul.f32 %v1198_v2, %v1181_v55 }
0x126b   :  { %1206 = vrot.lane.b32.xlu2 %v1200_v12, %s1711_s26 }
0x1273   :  { %1296 = vrot.lane.b32.xlu2 %v2029_v27, %s1712_s29  ;;  %v1289_v27 = vld [vmem:[%s2313_s9 + $0x8] sm:$0xff]  ;;  %s1714_s9 = smov [#allocation4]  }
0x1274   :  { %1340 = vmatpush.msra.mxu0 %v1289_v27  ;;  %s1392_s10 = sshll.u32 %s1714_s9, 4  ;;  %s1393_s10 = int_to_ptr.vmem [resolvable:$true] %s1392_s10 }
0x1276   :  { %1341 = vmatpush.msra.mxu0 %v1288_v25 }
0x127b   :  { %1300 = vrot.lane.b32.xlu2 %v2097_v37, %s1712_s29 }
0x1283   :  { %1306 = vrot.lane.b32.xlu2 %v2196_v29, %s1712_s29 }
0x128b   :  { %1272 = vrot.lane.b32.xlu2 %v1128_v59, %s1713_s8 }
0x12aa   :  { %v1203_v37 = vpop.permute.xlu1 %1202 }
0x12ab   :  { %1270 = vst.msk [vmem:[#allocation4] sm:$0xff] %vm139_vm1, %v1203_v37 }
0x12c5   :  { %v1207_v21 = vpop.permute.xlu2 %1206 }
0x12c6   :  { %v1209_v1 = vsel %vm139_vm1, %v1203_v37, %v1207_v21 }
0x12c7   :  { %1477 = vmatmul.msk.f32.vlgmr.msrb.gmra.mxu3 %vm362_vm6, %v1209_v1 }
0x12cd   :  { %v1297_v29 = vpop.permute.xlu2 %1296 }
0x12ce   :  { %1479 = vmatmul.msk.f32.vlgmr.msra.gmra.mxu0 %vm139_vm1, %v1297_v29 }
0x12d5   :  { %v1301_v11 = vpop.permute.xlu2 %1300 }
0x12dd   :  { %v2247_v26 = vpop.permute.xlu2 %1306 }
0x12e5   :  { %v1273_v31 = vpop.permute.xlu2 %1272 }
0x12e6   :  { %1275 = vst.msk [vmem:[#allocation6] sm:$0xff] %vm139_vm1, %v1273_v31 }
0x134a   :  { %v1230_v35 = vpop.f32.mrf.mxu3 }
0x134b   :  { %v1231_v24 = vadd.f32 %v2209_v28, %v1230_v35  ;;  %v1343_v36 = vpop.f32.mrf.mxu0 }
0x134c   :  { %v1344_v38 = vadd.f32 %v2253_v33, %v1343_v36 }
0x134d   :  { %1625 = vtanh.f32 %v1231_v24  ;;  %v1478_v23 = vmul.f32 -1.442695, %v1231_v24 }
0x134e   :  { %1367 = vst.msk [vmem:[#allocation2] sm:$0xff] %vm57_vm0, %v1344_v38 }
0x134f   :  { %1627 = vpow2.f32 %v1478_v23 }
0x1353   :  { %v1626_v6 = vpop.eup %1625 }
0x1354   :  { %1255 = vrot.lane.b32.xlu0 %v1626_v6, %s1711_s26 }
0x1355   :  { %v1628_v28 = vpop.eup %1627 }
0x1356   :  { %v1236_v8 = vadd.f32 1.0, %v1628_v28 }
0x1358   :  { %1629 = vrcp.f32 %v1236_v8  ;;  %v1248_v13 = vand.u32 2147483648, %v1236_v8  ;;  %vm1242_vm11 = vweird.f32 %v1236_v8  ;;  %v1246_v15 = vand.u32 2147483647, %v1236_v8 }
0x135a   :  { %v1249_v16 = vor.u32 1.1754944e-38, %v1248_v13  ;;  %vm1247_vm13 = vcmp.eq.f32.partialorder %v1246_v15, 8.507059e+37 }
0x135c   :  { %1298 = vrot.lane.b32.xlu0 %v2065_v32, %s1712_s29 }
0x135e   :  { %v1630_v30 = vpop.eup %1629 }
0x135f   :  { %v1238_v4 = vmul.f32 %v1630_v30, %v1236_v8  ;;  %vm1243_vm6 = vweird.f32 %v1630_v30 }
0x1360   :  { %vm1244_vm12 = vmor %vm1242_vm11, %vm1243_vm6 }
0x1361   :  { %v1239_v5 = vsub.f32 1.0, %v1238_v4 }
0x1363   :  { %v1240_v10 = vmul.f32 %v1630_v30, %v1239_v5 }
0x1364   :  { %1302 = vrot.lane.b32.xlu0 %v2133_v39, %s1712_s29 }
0x1365   :  { %v1241_v7 = vadd.f32 %v1630_v30, %v1240_v10 }
0x1367   :  { %v1245_v32 = vsel %vm1244_vm12, %v1630_v30, %v1241_v7 }
0x1368   :  { %v1250_v17 = vsel %vm1247_vm13, %v1249_v16, %v1245_v32 }
0x1369   :  { %v1253_v42 = vmul.f32 %v1250_v17, %v2218_v63 }
0x136c   :  { %1308 = vrot.lane.b32.xlu0 %v1200_v12, %s1712_s29 }
0x13c6   :  { %v1256_v39 = vpop.permute.xlu0 %1255 }
0x13c7   :  { %v1258_v19 = vmul.f32 %v1256_v39, %v1250_v17 }
0x13c9   :  { %1260 = vrot.lane.b32.xlu1 %v1258_v19, %s1712_s29 }
0x13ce   :  { %v1299_v14 = vpop.permute.xlu0 %1298 }
0x13cf   :  { %1480 = vmatmul.msk.f32.gmra.mxu0 %vm139_vm1, %v1299_v14 }
0x13d6   :  { %v1303_v41 = vpop.permute.xlu0 %1302 }
0x13d7   :  { %1481 = vmatmul.msk.f32.gmra.mxu0 %vm139_vm1, %v1301_v11 }
0x13de   :  { %v1309_v50 = vpop.permute.xlu0 %1308 }
0x13df   :  { %1482 = vmatmul.msk.f32.gmra.mxu0 %vm139_vm1, %v1303_v41 }
0x143b   :  { %v1261_v40 = vpop.permute.xlu1 %1260 }
0x143c   :  { %v1263_v43 = vadd.f32 %v1261_v40, %v1253_v42 }
0x143e   :  { %1631 = vtanh.f32 %v1263_v43  ;;  %1283 = vrot.lane.b32.xlu0 %v1263_v43, %s1713_s8 }
0x1444   :  { %v1632_v18 = vpop.eup %1631 }
0x1445   :  { %1266 = vrot.lane.b32.xlu1 %v1632_v18, %s1711_s26 }
0x144c   :  { %v1346_v44 = vpop.f32.mrf.mxu0 }
0x144d   :  { %v1347_v45 = vadd.f32 %v2253_v33, %v1346_v44  ;;  %1304 = vrot.lane.b32.xlu1 %v2165_v34, %s1712_s29 }
0x144f   :  { %1368 = vst.msk [vmem:[#allocation2 + $0x8] sm:$0xff] %vm57_vm0, %v1347_v45 }
0x1454   :  { %v1349_v46 = vpop.f32.mrf.mxu0 }
0x1455   :  { %v1350_v47 = vadd.f32 %v2253_v33, %v1349_v46 }
0x1457   :  { %1369 = vst.msk [vmem:[#allocation2 + $0x10] sm:$0xff] %vm57_vm0, %v1350_v47 }
0x145c   :  { %v1352_v48 = vpop.f32.mrf.mxu0 }
0x145d   :  { %v1353_v49 = vadd.f32 %v2253_v33, %v1352_v48 }
0x145f   :  { %1370 = vst.msk [vmem:[#allocation2 + $0x18] sm:$0xff] %vm57_vm0, %v1353_v49 }
0x14b0   :  { %v1284_v51 = vpop.permute.xlu0 %1283 }
0x14b1   :  { %1287 = vst.msk [vmem:[#allocation6 + $0x8] sm:$0xff] %vm139_vm1, %v1284_v51 }
0x14b7   :  { %v1267_v52 = vpop.permute.xlu1 %1266 }
0x14b8   :  { %v1269_v53 = vmul.f32 %v1267_v52, %v1250_v17 }
0x14ba   :  { %1277 = vrot.lane.b32.xlu1 %v1269_v53, %s1712_s29  ;;  %s1715_s29 = smov 128  }
0x14bf   :  { %v1305_v34 = vpop.permute.xlu1 %1304 }
0x14c0   :  { %1483 = vmatmul.msk.f32.gmra.mxu0 %vm139_vm1, %v1305_v34 }
0x14c8   :  { %1484 = vmatmul.msk.f32.gmra.mxu0 %vm139_vm1, %v2247_v26 }
0x14d0   :  { %1485 = vmatmul.msk.f32.gmra.mxu0 %vm139_vm1, %v1309_v50 }
0x152c   :  { %v1278_v54 = vpop.permute.xlu1 %1277 }
0x152d   :  { %1281 = vst.msk [vmem:[#allocation4 + $0x8] sm:$0xff] %vm139_vm1, %v1278_v54  ;;  %1486 = vmatmul.msk.f32.gmra.mxu0 %vm139_vm1, %v1278_v54 }
0x152e   :  { %1400 = dma.vmem_to_hbm [thread:$0]  %s1393_s10, 256, %s1395_s1, [#allocation5], %s1715_s29, %s1715_s29, %s1716_s4  }
0x152f   :  { %1413 = dma.vmem_to_hbm [thread:$0]  %s1406_s27, 256, %s1408_s30, [#allocation5], %s1715_s29, %s1715_s29, %s1716_s4  }
0x153d   :  { %v1355_v55 = vpop.f32.mrf.mxu0 }
0x153e   :  { %v1356_v56 = vadd.f32 %v2253_v33, %v1355_v55 }
0x1540   :  { %1371 = vst.msk [vmem:[#allocation2 + $0x20] sm:$0xff] %vm57_vm0, %v1356_v56 }
0x1545   :  { %v1358_v57 = vpop.f32.mrf.mxu0 }
0x1546   :  { %v1359_v58 = vadd.f32 %v2253_v33, %v1358_v57 }
0x1548   :  { %1372 = vst.msk [vmem:[#allocation2 + $0x28] sm:$0xff] %vm57_vm0, %v1359_v58 }
0x154d   :  { %v1361_v59 = vpop.f32.mrf.mxu0 }
0x154e   :  { %v1362_v60 = vadd.f32 %v2253_v33, %v1361_v59 }
0x1550   :  { %1373 = vst.msk [vmem:[#allocation2 + $0x30] sm:$0xff] %vm57_vm0, %v1362_v60 }
0x15aa   :  { %v1364_v61 = vpop.f32.mrf.mxu0 }
0x15ab   :  { %v1365_v62 = vadd.f32 %v2253_v33, %v1364_v61 }
0x15ad   :  { %1374 = vst.msk [vmem:[#allocation2 + $0x38] sm:$0xff] %vm57_vm0, %v1365_v62 }
0x15ae   :  { %1387 = dma.vmem_to_hbm [thread:$0]  %s1380_s13, 1024, %s1382_s15, [#allocation3], %s1715_s29, %s1715_s29, %s1716_s4  }
0x15af   :  { %1707 = dma.done.wait [#allocation3], 1024  }
0x15b0   :  { %1708 = vsyncadd [#allocation3], 4294966272 }
0x15b1   :  { %1709 = dma.done.wait [#allocation5], 512  }
0x15b2   :  { %1710 = vsyncadd [#allocation5], 4294966784 }
0x15b3   :  { %1426 = vsyncpa [#allocation3], 1 }
0x15b4   :  { %1427 = vsyncpa [#allocation5], 1 }

</bundles_post_ra>
